<compile_context>
chip_gen: v6e
topology: v6e:2x2x1
jax: 0.10.0
libtpu: 0.0.40
codegen_flags: <defaults>
</compile_context>

<pallas_src>
import math
import functools

import jax
import jax.numpy as jnp
from jax import lax
from jax.experimental import pallas as pl
from jax.experimental.pallas import tpu as pltpu


# ----------------------------- kernel -----------------------------

def _layernorm(x, gamma, beta, eps=1e-5):
    mu = jnp.mean(x, axis=-1, keepdims=True)
    var = jnp.mean(jnp.square(x - mu), axis=-1, keepdims=True)
    return (x - mu) * lax.rsqrt(var + eps) * gamma + beta


def _encoder_kernel(bias_ref, x_ref,
                    ln1_g, ln1_b, wqkv, bqkv, wo, bo,
                    ln2_g, ln2_b, w1, b1, w2, b2,
                    lnf_g, lnf_b,
                    o_ref, x_sc, ctx_sc, *, num_heads):
    """Whole encoder. grid=(batch_chunk, layer); activation carried in VMEM."""
    l = pl.program_id(1)
    n_layers = pl.num_programs(1)

    Bt, S, D = x_ref.shape
    H = num_heads
    dh = D // H
    scale = 1.0 / math.sqrt(dh)

    # Load the input activation once per batch chunk (start of the layer loop).
    @pl.when(l == 0)
    def _():
        x_sc[...] = x_ref[...].reshape(Bt * S, D).astype(jnp.float32)

    x = x_sc[...]                                           # (Bt*S, D) f32

    # ---- self-attention sub-layer (pre-norm residual) ----
    xn = _layernorm(x, ln1_g[0], ln1_b[0])
    qkv = jnp.dot(xn.astype(jnp.bfloat16), wqkv[0],
                  preferred_element_type=jnp.float32) + bqkv[0]   # (Bt*S, 3D) f32

    # Per-head context written into a (Bt*S, D) scratch at its column offset,
    # then one full-width output projection after the loop (no tiny K=dh dots).
    for b in range(Bt):      # TODO(synk): lax.fori_loop at production B/H sizes
        rows = slice(b * S, (b + 1) * S)
        kbias = bias_ref[b]                                  # (1, S) additive bias
        for h in range(H):
            lo = h * dh
            qh = (qkv[rows, lo:lo + dh] * scale).astype(jnp.bfloat16)
            kh = qkv[rows, D + lo:D + lo + dh].astype(jnp.bfloat16)
            vh = qkv[rows, 2 * D + lo:2 * D + lo + dh].astype(jnp.bfloat16)
            # q @ k^T (NT contraction, no explicit transpose), f32 accumulation.
            s = lax.dot_general(qh, kh, (((1,), (1,)), ((), ())),
                                preferred_element_type=jnp.float32)      # (S, S)
            s = s + kbias
            s = s - jnp.max(s, axis=-1, keepdims=True)
            p = jnp.exp(s)
            p = p * pl.reciprocal(jnp.sum(p, axis=-1, keepdims=True), approx=True)
            ctx = jnp.dot(p.astype(jnp.bfloat16), vh,
                          preferred_element_type=jnp.float32)            # (S, dh)
            ctx_sc[b * S:(b + 1) * S, lo:lo + dh] = ctx.astype(jnp.bfloat16)

    attn = jnp.dot(ctx_sc[...], wo[0], preferred_element_type=jnp.float32) + bo[0]
    x = x + attn

    # ---- feed-forward sub-layer (pre-norm residual) ----
    xn2 = _layernorm(x, ln2_g[0], ln2_b[0])
    h1 = jnp.maximum(jnp.dot(xn2.astype(jnp.bfloat16), w1[0],
                             preferred_element_type=jnp.float32) + b1[0], 0.0)
    x = x + jnp.dot(h1.astype(jnp.bfloat16), w2[0],
                    preferred_element_type=jnp.float32) + b2[0]

    x_sc[...] = x

    # ---- final LayerNorm, written once per batch chunk ----
    @pl.when(l == n_layers - 1)
    def _():
        o_ref[...] = _layernorm(x, lnf_g[...], lnf_b[...]
                                ).reshape(Bt, S, D).astype(o_ref.dtype)


# ----------------------------- wrapper -----------------------------

def encoder_forward(x, key_valid, params, *, batch_block=None):
    """Encoder.forward.  key_valid: (B, S) float, 1.0 = attend, 0.0 = masked key."""
    B, S, D = x.shape
    L = params["wqkv"].shape[0]
    H = params["num_heads"]
    DFF = params["w1"].shape[-1]
    Bt = B if batch_block is None else batch_block
    assert B % Bt == 0

    # Additive attention bias, computed once outside the kernel (0 / -1e9).
    bias = jnp.where(key_valid > 0.0, 0.0, -1e9).astype(jnp.float32)[:, None, :]

    def batched(shape):      # per-batch-chunk blocks (constant across layer axis)
        return pl.BlockSpec(shape, lambda b, l: (b, 0, 0))

    def per_layer(shape):    # stacked per-layer params, indexed by the layer axis
        return pl.BlockSpec(shape, lambda b, l: (l, 0, 0))

    def shared2(shape):      # constant across the whole grid (final LayerNorm)
        return pl.BlockSpec(shape, lambda b, l: (0, 0))

    in_specs = [
        batched((Bt, 1, S)),                                   # mask bias
        batched((Bt, S, D)),                                   # x
        per_layer((1, 1, D)), per_layer((1, 1, D)),            # ln1 gamma/beta
        per_layer((1, D, 3 * D)), per_layer((1, 1, 3 * D)),    # fused QKV W/b
        per_layer((1, D, D)), per_layer((1, 1, D)),            # Wo/bo
        per_layer((1, 1, D)), per_layer((1, 1, D)),            # ln2 gamma/beta
        per_layer((1, D, DFF)), per_layer((1, 1, DFF)),        # W1/b1
        per_layer((1, DFF, D)), per_layer((1, 1, D)),          # W2/b2
        shared2((1, D)), shared2((1, D)),                      # final LN gamma/beta
    ]

    # VMEM budget: double-buffered bf16 layer-weight block + f32 biases/LN +
    # activation scratches + x/bias/out blocks, with headroom.
    w_bytes = 2 * (D * 3 * D + D * D + D * DFF + DFF * D)           # bf16 weights/layer
    b_bytes = 4 * (3 * D + D + DFF + D + 4 * D)                      # f32 biases + LN/layer
    act_bytes = Bt * S * (D * 4 + D * 2) + 2 * Bt * S * D * 4 + Bt * S * 4
    vmem_limit = int(1.5 * (2 * (w_bytes + b_bytes) + act_bytes)) + (2 << 20)
    vmem_limit = min(vmem_limit, 64 << 20)

    return pl.pallas_call(
        functools.partial(_encoder_kernel, num_heads=H),
        out_shape=jax.ShapeDtypeStruct((B, S, D), x.dtype),
        grid=(B // Bt, L),
        in_specs=in_specs,
        out_specs=pl.BlockSpec((Bt, S, D), lambda b, l: (b, 0, 0)),
        scratch_shapes=[pltpu.VMEM((Bt * S, D), jnp.float32),     # running activation
                        pltpu.VMEM((Bt * S, D), jnp.bfloat16)],   # per-head context
        compiler_params=pltpu.CompilerParams(
            dimension_semantics=("parallel", "arbitrary"),
            vmem_limit_bytes=vmem_limit),
    )(bias, x,
      params["ln1_g"], params["ln1_b"],
      params["wqkv"], params["bqkv"],
      params["wo"], params["bo"],
      params["ln2_g"], params["ln2_b"],
      params["w1"], params["b1"],
      params["w2"], params["b2"],
      params["ln_g"], params["ln_b"])


# ----------------------------- pure-JAX reference -----------------------------

def _ref_encoder(x, key_valid, p):
    def ln(t, g, b):
        mu = jnp.mean(t, -1, keepdims=True)
        var = jnp.mean((t - mu) ** 2, -1, keepdims=True)
        return (t - mu) / jnp.sqrt(var + 1e-5) * g + b

    B, S, D = x.shape
    H = p["num_heads"]
    dh = D // H
    mask = key_valid[:, None, :]
    L = p["wqkv"].shape[0]
    f32 = jnp.float32
    for i in range(L):
        xn = ln(x, p["ln1_g"][i], p["ln1_b"][i])
        qkv = xn @ p["wqkv"][i].astype(f32) + p["bqkv"][i]
        q, k, v = qkv[..., :D], qkv[..., D:2 * D], qkv[..., 2 * D:]
        outs = []
        for h in range(H):
            qh, kh, vh = (t[..., h * dh:(h + 1) * dh] for t in (q, k, v))
            s = jnp.einsum("bqd,bkd->bqk", qh, kh) / math.sqrt(dh)
            s = jnp.where(mask == 0.0, -1e9, s)
            pr = jax.nn.softmax(s, axis=-1)
            outs.append(jnp.einsum("bqk,bkd->bqd", pr, vh))
        attn = jnp.concatenate(outs, -1) @ p["wo"][i].astype(f32) + p["bo"][i]
        x = x + attn
        xn2 = ln(x, p["ln2_g"][i], p["ln2_b"][i])
        ff = (jnp.maximum(xn2 @ p["w1"][i].astype(f32) + p["b1"][i], 0.0)
              @ p["w2"][i].astype(f32) + p["b2"][i])
        x = x + ff
    return ln(x, p["ln_g"], p["ln_b"])


# ----------------------------- parameter init -----------------------------

def init_params(key, num_layers, d_model, num_heads, d_ff):
    def linear(k, fi, fo):
        kw, kb = jax.random.split(k)
        w = jax.random.normal(kw, (fi, fo), jnp.float32) / math.sqrt(fi)
        b = 0.01 * jax.random.normal(kb, (1, fo), jnp.float32)
        return w, b

    wqkv, bqkv, wo, bo, w1, b1, w2, b2 = ([] for _ in range(8))
    for _ in range(num_layers):
        key, kq, kk, kv, ko, k1, k2 = jax.random.split(key, 7)
        wq_, bq_ = linear(kq, d_model, d_model)
        wk_, bk_ = linear(kk, d_model, d_model)
        wv_, bv_ = linear(kv, d_model, d_model)
        wqkv.append(jnp.concatenate([wq_, wk_, wv_], axis=1))
        bqkv.append(jnp.concatenate([bq_, bk_, bv_], axis=1))
        w, b = linear(ko, d_model, d_model); wo.append(w); bo.append(b)
        w, b = linear(k1, d_model, d_ff);    w1.append(w); b1.append(b)
        w, b = linear(k2, d_ff, d_model);    w2.append(w); b2.append(b)

    stack_bf16 = lambda lst: jnp.stack(lst, axis=0).astype(jnp.bfloat16)
    stack_f32 = lambda lst: jnp.stack(lst, axis=0)
    L = num_layers
    return dict(
        num_heads=num_heads,
        ln1_g=jnp.ones((L, 1, d_model), jnp.float32),
        ln1_b=jnp.zeros((L, 1, d_model), jnp.float32),
        # matmul weights stored bf16 (bandwidth + MXU rate); biases / LN f32
        wqkv=stack_bf16(wqkv), bqkv=stack_f32(bqkv),
        wo=stack_bf16(wo), bo=stack_f32(bo),
        ln2_g=jnp.ones((L, 1, d_model), jnp.float32),
        ln2_b=jnp.zeros((L, 1, d_model), jnp.float32),
        w1=stack_bf16(w1), b1=stack_f32(b1),
        w2=stack_bf16(w2), b2=stack_f32(b2),
        ln_g=jnp.ones((1, d_model), jnp.float32),
        ln_b=jnp.zeros((1, d_model), jnp.float32),
    )


# ----------------------------- main -----------------------------

if __name__ == "__main__":
    B, S, D, H, DFF, NLAYERS = 2, 8, 32, 4, 64, 2

    key = jax.random.PRNGKey(0)
    key, kx = jax.random.split(key)
    x = jax.random.normal(kx, (B, S, D), jnp.float32)

    # padding mask: batch 0 attends to all 8 keys, batch 1 only to the first 6
    lengths = jnp.array([8, 6], jnp.int32)
    key_valid = (jnp.arange(S)[None, :] < lengths[:, None]).astype(jnp.float32)

    params = init_params(key, NLAYERS, D, H, DFF)

    out = jax.block_until_ready(encoder_forward(x, key_valid, params))
    ref = _ref_encoder(x, key_valid, params)

    assert out.shape == (B, S, D)
    # Kernel uses bf16 matmul inputs (f32 accumulation) + approx reciprocal;
    # reference is full f32 with the same bf16-stored weights.
    assert jnp.allclose(out, ref, atol=5e-2, rtol=5e-2), "mismatch vs JAX reference"

    print("KERNEL_OK")
</pallas_src>

<mosaic_0001>
module attributes {stable_mosaic.version = 11 : i64} {
  func.func @_encoder_kernel(%arg0: i32, %arg1: i32, %arg2: memref<2x1x8xf32, #tpu.memory_space<vmem>>, %arg3: memref<2x8x32xf32, #tpu.memory_space<vmem>>, %arg4: memref<1x1x32xf32, #tpu.memory_space<vmem>>, %arg5: memref<1x1x32xf32, #tpu.memory_space<vmem>>, %arg6: memref<1x32x96xbf16, #tpu.memory_space<vmem>>, %arg7: memref<1x1x96xf32, #tpu.memory_space<vmem>>, %arg8: memref<1x32x32xbf16, #tpu.memory_space<vmem>>, %arg9: memref<1x1x32xf32, #tpu.memory_space<vmem>>, %arg10: memref<1x1x32xf32, #tpu.memory_space<vmem>>, %arg11: memref<1x1x32xf32, #tpu.memory_space<vmem>>, %arg12: memref<1x32x64xbf16, #tpu.memory_space<vmem>>, %arg13: memref<1x1x64xf32, #tpu.memory_space<vmem>>, %arg14: memref<1x64x32xbf16, #tpu.memory_space<vmem>>, %arg15: memref<1x1x32xf32, #tpu.memory_space<vmem>>, %arg16: memref<1x32xf32, #tpu.memory_space<vmem>>, %arg17: memref<1x32xf32, #tpu.memory_space<vmem>>, %arg18: memref<2x8x32xf32, #tpu.memory_space<vmem>>, %arg19: memref<16x32xf32, #tpu.memory_space<vmem>>, %arg20: memref<16x32xbf16, #tpu.memory_space<vmem>>) attributes {dimension_semantics = [#tpu.dimension_semantics<parallel>, #tpu.dimension_semantics<arbitrary>], iteration_bounds = array<i64: 1, 2>, scalar_prefetch = 0 : i64, scratch_operands = 2 : i64, tpu.core_type = #tpu.core_type<tc>, window_params = [{transform_indices = @transform_0, window_bounds = array<i64: 2, 1, 8>}, {transform_indices = @transform_1, window_bounds = array<i64: 2, 8, 32>}, {transform_indices = @transform_2, window_bounds = array<i64: 1, 1, 32>}, {transform_indices = @transform_3, window_bounds = array<i64: 1, 1, 32>}, {transform_indices = @transform_4, window_bounds = array<i64: 1, 32, 96>}, {transform_indices = @transform_5, window_bounds = array<i64: 1, 1, 96>}, {transform_indices = @transform_6, window_bounds = array<i64: 1, 32, 32>}, {transform_indices = @transform_7, window_bounds = array<i64: 1, 1, 32>}, {transform_indices = @transform_8, window_bounds = array<i64: 1, 1, 32>}, {transform_indices = @transform_9, window_bounds = array<i64: 1, 1, 32>}, {transform_indices = @transform_10, window_bounds = array<i64: 1, 32, 64>}, {transform_indices = @transform_11, window_bounds = array<i64: 1, 1, 64>}, {transform_indices = @transform_12, window_bounds = array<i64: 1, 64, 32>}, {transform_indices = @transform_13, window_bounds = array<i64: 1, 1, 32>}, {pipeline_mode = #tpu.pipeline_mode<synchronous>, transform_indices = @transform_14, window_bounds = array<i64: 1, 32>}, {pipeline_mode = #tpu.pipeline_mode<synchronous>, transform_indices = @transform_15, window_bounds = array<i64: 1, 32>}, {transform_indices = @transform_16, window_bounds = array<i64: 2, 8, 32>}]} {
    %c0_i32 = arith.constant 0 : i32
    %0 = arith.cmpi eq, %arg1, %c0_i32 : i32
    %1 = arith.extui %0 : i1 to i32
    %c0_i32_0 = arith.constant 0 : i32
    %2 = arith.cmpi ne, %1, %c0_i32_0 : i32
    scf.if %2 {
      %c0_115 = arith.constant 0 : index
      %c0_116 = arith.constant 0 : index
      %c0_117 = arith.constant 0 : index
      %300 = vector.load %arg3[%c0_115, %c0_116, %c0_117] : memref<2x8x32xf32, #tpu.memory_space<vmem>>, vector<2x8x32xf32>
      %301 = vector.shape_cast %300 : vector<2x8x32xf32> to vector<16x32xf32>
      %c0_118 = arith.constant 0 : index
      %c0_119 = arith.constant 0 : index
      %302 = vector.load %arg19[%c0_118, %c0_119] : memref<16x32xf32, #tpu.memory_space<vmem>>, vector<16x32xf32>
      tpu.vector_store %arg19[%c0_118, %c0_119], %301 {strides = array<i32>} : memref<16x32xf32, #tpu.memory_space<vmem>>, vector<16x32xf32>,
    } else {
    }
    %c0 = arith.constant 0 : index
    %c0_1 = arith.constant 0 : index
    %3 = vector.load %arg19[%c0, %c0_1] : memref<16x32xf32, #tpu.memory_space<vmem>>, vector<16x32xf32>
    %c0_2 = arith.constant 0 : index
    %c0_3 = arith.constant 0 : index
    %c0_4 = arith.constant 0 : index
    %4 = vector.load %arg4[%c0_2, %c0_3, %c0_4] : memref<1x1x32xf32, #tpu.memory_space<vmem>>, vector<1x1x32xf32>
    %5 = vector.shape_cast %4 : vector<1x1x32xf32> to vector<1x32xf32>
    %c0_5 = arith.constant 0 : index
    %c0_6 = arith.constant 0 : index
    %c0_7 = arith.constant 0 : index
    %6 = vector.load %arg5[%c0_5, %c0_6, %c0_7] : memref<1x1x32xf32, #tpu.memory_space<vmem>>, vector<1x1x32xf32>
    %7 = vector.shape_cast %6 : vector<1x1x32xf32> to vector<1x32xf32>
    %cst = arith.constant dense<0.000000e+00> : vector<16xf32>
    %8 = vector.multi_reduction <add>, %3, %cst [1] : vector<16x32xf32> to vector<16xf32>
    %9 = vector.shape_cast %8 : vector<16xf32> to vector<16x1xf32>
    %cst_8 = arith.constant 3.200000e+01 : f32
    %10 = vector.broadcast %cst_8 : f32 to vector<16x1xf32>
    %11 = arith.divf %9, %10 : vector<16x1xf32>
    %12 = vector.broadcast %11 : vector<16x1xf32> to vector<16x32xf32>
    %13 = arith.subf %3, %12 : vector<16x32xf32>
    %14 = arith.mulf %13, %13 : vector<16x32xf32>
    %cst_9 = arith.constant dense<0.000000e+00> : vector<16xf32>
    %15 = vector.multi_reduction <add>, %14, %cst_9 [1] : vector<16x32xf32> to vector<16xf32>
    %16 = vector.shape_cast %15 : vector<16xf32> to vector<16x1xf32>
    %cst_10 = arith.constant 3.200000e+01 : f32
    %17 = vector.broadcast %cst_10 : f32 to vector<16x1xf32>
    %18 = arith.divf %16, %17 : vector<16x1xf32>
    %19 = vector.broadcast %11 : vector<16x1xf32> to vector<16x32xf32>
    %20 = arith.subf %3, %19 : vector<16x32xf32>
    %cst_11 = arith.constant 9.99999974E-6 : f32
    %21 = vector.broadcast %cst_11 : f32 to vector<16x1xf32>
    %22 = arith.addf %18, %21 : vector<16x1xf32>
    %23 = math.rsqrt %22 : vector<16x1xf32>
    %24 = vector.broadcast %23 : vector<16x1xf32> to vector<16x32xf32>
    %25 = arith.mulf %20, %24 : vector<16x32xf32>
    %26 = vector.broadcast %5 : vector<1x32xf32> to vector<16x32xf32>
    %27 = arith.mulf %25, %26 : vector<16x32xf32>
    %28 = vector.broadcast %7 : vector<1x32xf32> to vector<16x32xf32>
    %29 = arith.addf %27, %28 : vector<16x32xf32>
    %30 = arith.truncf %29 : vector<16x32xf32> to vector<16x32xbf16>
    %c0_12 = arith.constant 0 : index
    %c0_13 = arith.constant 0 : index
    %c0_14 = arith.constant 0 : index
    %31 = vector.load %arg6[%c0_12, %c0_13, %c0_14] : memref<1x32x96xbf16, #tpu.memory_space<vmem>>, vector<1x32x96xbf16>
    %32 = vector.shape_cast %31 : vector<1x32x96xbf16> to vector<32x96xbf16>
    %cst_15 = arith.constant dense<0.000000e+00> : vector<16x96xf32>
    %33 = tpu.matmul %30, %32, %cst_15 {dimension_numbers = #tpu.dot_dimension_numbers<[1], [0], [0], [1], [0, 0, 1, 1], [], []>} : vector<16x32xbf16>, vector<32x96xbf16>, vector<16x96xf32> -> vector<16x96xf32>
    %c0_16 = arith.constant 0 : index
    %c0_17 = arith.constant 0 : index
    %c0_18 = arith.constant 0 : index
    %34 = vector.load %arg7[%c0_16, %c0_17, %c0_18] : memref<1x1x96xf32, #tpu.memory_space<vmem>>, vector<1x1x96xf32>
    %35 = vector.shape_cast %34 : vector<1x1x96xf32> to vector<1x96xf32>
    %36 = vector.broadcast %35 : vector<1x96xf32> to vector<16x96xf32>
    %37 = arith.addf %33, %36 : vector<16x96xf32>
    %c0_19 = arith.constant 0 : index
    %c0_20 = arith.constant 0 : index
    %c0_21 = arith.constant 0 : index
    %38 = vector.load %arg2[%c0_19, %c0_20, %c0_21] : memref<2x1x8xf32, #tpu.memory_space<vmem>>, vector<1x1x8xf32>
    %39 = vector.shape_cast %38 : vector<1x1x8xf32> to vector<1x8xf32>
    %40 = vector.extract_strided_slice %37 {offsets = [0, 0], sizes = [8, 8], strides = [1, 1]} : vector<16x96xf32> to vector<8x8xf32>
    %cst_22 = arith.constant 0.353553385 : f32
    %41 = vector.broadcast %cst_22 : f32 to vector<8x8xf32>
    %42 = arith.mulf %40, %41 : vector<8x8xf32>
    %43 = arith.truncf %42 : vector<8x8xf32> to vector<8x8xbf16>
    %44 = vector.extract_strided_slice %37 {offsets = [0, 32], sizes = [8, 8], strides = [1, 1]} : vector<16x96xf32> to vector<8x8xf32>
    %45 = arith.truncf %44 : vector<8x8xf32> to vector<8x8xbf16>
    %46 = vector.extract_strided_slice %37 {offsets = [0, 64], sizes = [8, 8], strides = [1, 1]} : vector<16x96xf32> to vector<8x8xf32>
    %47 = arith.truncf %46 : vector<8x8xf32> to vector<8x8xbf16>
    %cst_23 = arith.constant dense<0.000000e+00> : vector<8x8xf32>
    %48 = tpu.matmul %43, %45, %cst_23 {dimension_numbers = #tpu.dot_dimension_numbers<[1], [1], [0], [0], [0, 0, 1, 0], [], []>} : vector<8x8xbf16>, vector<8x8xbf16>, vector<8x8xf32> -> vector<8x8xf32>
    %49 = vector.broadcast %39 : vector<1x8xf32> to vector<8x8xf32>
    %50 = arith.addf %48, %49 : vector<8x8xf32>
    %cst_24 = arith.constant dense<0xFF800000> : vector<8xf32>
    %51 = vector.multi_reduction <maximumf>, %50, %cst_24 [1] : vector<8x8xf32> to vector<8xf32>
    %52 = vector.shape_cast %51 : vector<8xf32> to vector<8x1xf32>
    %53 = vector.broadcast %52 : vector<8x1xf32> to vector<8x8xf32>
    %54 = arith.subf %50, %53 : vector<8x8xf32>
    %55 = math.exp %54 : vector<8x8xf32>
    %cst_25 = arith.constant dense<0.000000e+00> : vector<8xf32>
    %56 = vector.multi_reduction <add>, %55, %cst_25 [1] : vector<8x8xf32> to vector<8xf32>
    %57 = vector.shape_cast %56 : vector<8xf32> to vector<8x1xf32>
    %58 = tpu.reciprocal %57 {approx = true} : vector<8x1xf32> -> vector<8x1xf32>
    %59 = vector.broadcast %58 : vector<8x1xf32> to vector<8x8xf32>
    %60 = arith.mulf %55, %59 : vector<8x8xf32>
    %61 = arith.truncf %60 : vector<8x8xf32> to vector<8x8xbf16>
    %cst_26 = arith.constant dense<0.000000e+00> : vector<8x8xf32>
    %62 = tpu.matmul %61, %47, %cst_26 {dimension_numbers = #tpu.dot_dimension_numbers<[1], [0], [0], [1], [0, 0, 1, 1], [], []>} : vector<8x8xbf16>, vector<8x8xbf16>, vector<8x8xf32> -> vector<8x8xf32>
    %63 = arith.truncf %62 : vector<8x8xf32> to vector<8x8xbf16>
    %c0_27 = arith.constant 0 : index
    %c0_28 = arith.constant 0 : index
    %64 = vector.load %arg20[%c0_27, %c0_28] : memref<16x32xbf16, #tpu.memory_space<vmem>>, vector<8x8xbf16>
    tpu.vector_store %arg20[%c0_27, %c0_28], %63 {strides = array<i32>} : memref<16x32xbf16, #tpu.memory_space<vmem>>, vector<8x8xbf16>,
    %65 = vector.extract_strided_slice %37 {offsets = [0, 8], sizes = [8, 8], strides = [1, 1]} : vector<16x96xf32> to vector<8x8xf32>
    %cst_29 = arith.constant 0.353553385 : f32
    %66 = vector.broadcast %cst_29 : f32 to vector<8x8xf32>
    %67 = arith.mulf %65, %66 : vector<8x8xf32>
    %68 = arith.truncf %67 : vector<8x8xf32> to vector<8x8xbf16>
    %69 = vector.extract_strided_slice %37 {offsets = [0, 40], sizes = [8, 8], strides = [1, 1]} : vector<16x96xf32> to vector<8x8xf32>
    %70 = arith.truncf %69 : vector<8x8xf32> to vector<8x8xbf16>
    %71 = vector.extract_strided_slice %37 {offsets = [0, 72], sizes = [8, 8], strides = [1, 1]} : vector<16x96xf32> to vector<8x8xf32>
    %72 = arith.truncf %71 : vector<8x8xf32> to vector<8x8xbf16>
    %cst_30 = arith.constant dense<0.000000e+00> : vector<8x8xf32>
    %73 = tpu.matmul %68, %70, %cst_30 {dimension_numbers = #tpu.dot_dimension_numbers<[1], [1], [0], [0], [0, 0, 1, 0], [], []>} : vector<8x8xbf16>, vector<8x8xbf16>, vector<8x8xf32> -> vector<8x8xf32>
    %74 = vector.broadcast %39 : vector<1x8xf32> to vector<8x8xf32>
    %75 = arith.addf %73, %74 : vector<8x8xf32>
    %cst_31 = arith.constant dense<0xFF800000> : vector<8xf32>
    %76 = vector.multi_reduction <maximumf>, %75, %cst_31 [1] : vector<8x8xf32> to vector<8xf32>
    %77 = vector.shape_cast %76 : vector<8xf32> to vector<8x1xf32>
    %78 = vector.broadcast %77 : vector<8x1xf32> to vector<8x8xf32>
    %79 = arith.subf %75, %78 : vector<8x8xf32>
    %80 = math.exp %79 : vector<8x8xf32>
    %cst_32 = arith.constant dense<0.000000e+00> : vector<8xf32>
    %81 = vector.multi_reduction <add>, %80, %cst_32 [1] : vector<8x8xf32> to vector<8xf32>
    %82 = vector.shape_cast %81 : vector<8xf32> to vector<8x1xf32>
    %83 = tpu.reciprocal %82 {approx = true} : vector<8x1xf32> -> vector<8x1xf32>
    %84 = vector.broadcast %83 : vector<8x1xf32> to vector<8x8xf32>
    %85 = arith.mulf %80, %84 : vector<8x8xf32>
    %86 = arith.truncf %85 : vector<8x8xf32> to vector<8x8xbf16>
    %cst_33 = arith.constant dense<0.000000e+00> : vector<8x8xf32>
    %87 = tpu.matmul %86, %72, %cst_33 {dimension_numbers = #tpu.dot_dimension_numbers<[1], [0], [0], [1], [0, 0, 1, 1], [], []>} : vector<8x8xbf16>, vector<8x8xbf16>, vector<8x8xf32> -> vector<8x8xf32>
    %88 = arith.truncf %87 : vector<8x8xf32> to vector<8x8xbf16>
    %c0_34 = arith.constant 0 : index
    %c8 = arith.constant 8 : index
    %89 = vector.load %arg20[%c0_34, %c8] : memref<16x32xbf16, #tpu.memory_space<vmem>>, vector<8x8xbf16>
    tpu.vector_store %arg20[%c0_34, %c8], %88 {strides = array<i32>} : memref<16x32xbf16, #tpu.memory_space<vmem>>, vector<8x8xbf16>,
    %90 = vector.extract_strided_slice %37 {offsets = [0, 16], sizes = [8, 8], strides = [1, 1]} : vector<16x96xf32> to vector<8x8xf32>
    %cst_35 = arith.constant 0.353553385 : f32
    %91 = vector.broadcast %cst_35 : f32 to vector<8x8xf32>
    %92 = arith.mulf %90, %91 : vector<8x8xf32>
    %93 = arith.truncf %92 : vector<8x8xf32> to vector<8x8xbf16>
    %94 = vector.extract_strided_slice %37 {offsets = [0, 48], sizes = [8, 8], strides = [1, 1]} : vector<16x96xf32> to vector<8x8xf32>
    %95 = arith.truncf %94 : vector<8x8xf32> to vector<8x8xbf16>
    %96 = vector.extract_strided_slice %37 {offsets = [0, 80], sizes = [8, 8], strides = [1, 1]} : vector<16x96xf32> to vector<8x8xf32>
    %97 = arith.truncf %96 : vector<8x8xf32> to vector<8x8xbf16>
    %cst_36 = arith.constant dense<0.000000e+00> : vector<8x8xf32>
    %98 = tpu.matmul %93, %95, %cst_36 {dimension_numbers = #tpu.dot_dimension_numbers<[1], [1], [0], [0], [0, 0, 1, 0], [], []>} : vector<8x8xbf16>, vector<8x8xbf16>, vector<8x8xf32> -> vector<8x8xf32>
    %99 = vector.broadcast %39 : vector<1x8xf32> to vector<8x8xf32>
    %100 = arith.addf %98, %99 : vector<8x8xf32>
    %cst_37 = arith.constant dense<0xFF800000> : vector<8xf32>
    %101 = vector.multi_reduction <maximumf>, %100, %cst_37 [1] : vector<8x8xf32> to vector<8xf32>
    %102 = vector.shape_cast %101 : vector<8xf32> to vector<8x1xf32>
    %103 = vector.broadcast %102 : vector<8x1xf32> to vector<8x8xf32>
    %104 = arith.subf %100, %103 : vector<8x8xf32>
    %105 = math.exp %104 : vector<8x8xf32>
    %cst_38 = arith.constant dense<0.000000e+00> : vector<8xf32>
    %106 = vector.multi_reduction <add>, %105, %cst_38 [1] : vector<8x8xf32> to vector<8xf32>
    %107 = vector.shape_cast %106 : vector<8xf32> to vector<8x1xf32>
    %108 = tpu.reciprocal %107 {approx = true} : vector<8x1xf32> -> vector<8x1xf32>
    %109 = vector.broadcast %108 : vector<8x1xf32> to vector<8x8xf32>
    %110 = arith.mulf %105, %109 : vector<8x8xf32>
    %111 = arith.truncf %110 : vector<8x8xf32> to vector<8x8xbf16>
    %cst_39 = arith.constant dense<0.000000e+00> : vector<8x8xf32>
    %112 = tpu.matmul %111, %97, %cst_39 {dimension_numbers = #tpu.dot_dimension_numbers<[1], [0], [0], [1], [0, 0, 1, 1], [], []>} : vector<8x8xbf16>, vector<8x8xbf16>, vector<8x8xf32> -> vector<8x8xf32>
    %113 = arith.truncf %112 : vector<8x8xf32> to vector<8x8xbf16>
    %c0_40 = arith.constant 0 : index
    %c16 = arith.constant 16 : index
    %114 = vector.load %arg20[%c0_40, %c16] : memref<16x32xbf16, #tpu.memory_space<vmem>>, vector<8x8xbf16>
    tpu.vector_store %arg20[%c0_40, %c16], %113 {strides = array<i32>} : memref<16x32xbf16, #tpu.memory_space<vmem>>, vector<8x8xbf16>,
    %115 = vector.extract_strided_slice %37 {offsets = [0, 24], sizes = [8, 8], strides = [1, 1]} : vector<16x96xf32> to vector<8x8xf32>
    %cst_41 = arith.constant 0.353553385 : f32
    %116 = vector.broadcast %cst_41 : f32 to vector<8x8xf32>
    %117 = arith.mulf %115, %116 : vector<8x8xf32>
    %118 = arith.truncf %117 : vector<8x8xf32> to vector<8x8xbf16>
    %119 = vector.extract_strided_slice %37 {offsets = [0, 56], sizes = [8, 8], strides = [1, 1]} : vector<16x96xf32> to vector<8x8xf32>
    %120 = arith.truncf %119 : vector<8x8xf32> to vector<8x8xbf16>
    %121 = vector.extract_strided_slice %37 {offsets = [0, 88], sizes = [8, 8], strides = [1, 1]} : vector<16x96xf32> to vector<8x8xf32>
    %122 = arith.truncf %121 : vector<8x8xf32> to vector<8x8xbf16>
    %cst_42 = arith.constant dense<0.000000e+00> : vector<8x8xf32>
    %123 = tpu.matmul %118, %120, %cst_42 {dimension_numbers = #tpu.dot_dimension_numbers<[1], [1], [0], [0], [0, 0, 1, 0], [], []>} : vector<8x8xbf16>, vector<8x8xbf16>, vector<8x8xf32> -> vector<8x8xf32>
    %124 = vector.broadcast %39 : vector<1x8xf32> to vector<8x8xf32>
    %125 = arith.addf %123, %124 : vector<8x8xf32>
    %cst_43 = arith.constant dense<0xFF800000> : vector<8xf32>
    %126 = vector.multi_reduction <maximumf>, %125, %cst_43 [1] : vector<8x8xf32> to vector<8xf32>
    %127 = vector.shape_cast %126 : vector<8xf32> to vector<8x1xf32>
    %128 = vector.broadcast %127 : vector<8x1xf32> to vector<8x8xf32>
    %129 = arith.subf %125, %128 : vector<8x8xf32>
    %130 = math.exp %129 : vector<8x8xf32>
    %cst_44 = arith.constant dense<0.000000e+00> : vector<8xf32>
    %131 = vector.multi_reduction <add>, %130, %cst_44 [1] : vector<8x8xf32> to vector<8xf32>
    %132 = vector.shape_cast %131 : vector<8xf32> to vector<8x1xf32>
    %133 = tpu.reciprocal %132 {approx = true} : vector<8x1xf32> -> vector<8x1xf32>
    %134 = vector.broadcast %133 : vector<8x1xf32> to vector<8x8xf32>
    %135 = arith.mulf %130, %134 : vector<8x8xf32>
    %136 = arith.truncf %135 : vector<8x8xf32> to vector<8x8xbf16>
    %cst_45 = arith.constant dense<0.000000e+00> : vector<8x8xf32>
    %137 = tpu.matmul %136, %122, %cst_45 {dimension_numbers = #tpu.dot_dimension_numbers<[1], [0], [0], [1], [0, 0, 1, 1], [], []>} : vector<8x8xbf16>, vector<8x8xbf16>, vector<8x8xf32> -> vector<8x8xf32>
    %138 = arith.truncf %137 : vector<8x8xf32> to vector<8x8xbf16>
    %c0_46 = arith.constant 0 : index
    %c24 = arith.constant 24 : index
    %139 = vector.load %arg20[%c0_46, %c24] : memref<16x32xbf16, #tpu.memory_space<vmem>>, vector<8x8xbf16>
    tpu.vector_store %arg20[%c0_46, %c24], %138 {strides = array<i32>} : memref<16x32xbf16, #tpu.memory_space<vmem>>, vector<8x8xbf16>,
    %c1 = arith.constant 1 : index
    %c0_47 = arith.constant 0 : index
    %c0_48 = arith.constant 0 : index
    %140 = vector.load %arg2[%c1, %c0_47, %c0_48] : memref<2x1x8xf32, #tpu.memory_space<vmem>>, vector<1x1x8xf32>
    %141 = vector.shape_cast %140 : vector<1x1x8xf32> to vector<1x8xf32>
    %142 = vector.extract_strided_slice %37 {offsets = [8, 0], sizes = [8, 8], strides = [1, 1]} : vector<16x96xf32> to vector<8x8xf32>
    %cst_49 = arith.constant 0.353553385 : f32
    %143 = vector.broadcast %cst_49 : f32 to vector<8x8xf32>
    %144 = arith.mulf %142, %143 : vector<8x8xf32>
    %145 = arith.truncf %144 : vector<8x8xf32> to vector<8x8xbf16>
    %146 = vector.extract_strided_slice %37 {offsets = [8, 32], sizes = [8, 8], strides = [1, 1]} : vector<16x96xf32> to vector<8x8xf32>
    %147 = arith.truncf %146 : vector<8x8xf32> to vector<8x8xbf16>
    %148 = vector.extract_strided_slice %37 {offsets = [8, 64], sizes = [8, 8], strides = [1, 1]} : vector<16x96xf32> to vector<8x8xf32>
    %149 = arith.truncf %148 : vector<8x8xf32> to vector<8x8xbf16>
    %cst_50 = arith.constant dense<0.000000e+00> : vector<8x8xf32>
    %150 = tpu.matmul %145, %147, %cst_50 {dimension_numbers = #tpu.dot_dimension_numbers<[1], [1], [0], [0], [0, 0, 1, 0], [], []>} : vector<8x8xbf16>, vector<8x8xbf16>, vector<8x8xf32> -> vector<8x8xf32>
    %151 = vector.broadcast %141 : vector<1x8xf32> to vector<8x8xf32>
    %152 = arith.addf %150, %151 : vector<8x8xf32>
    %cst_51 = arith.constant dense<0xFF800000> : vector<8xf32>
    %153 = vector.multi_reduction <maximumf>, %152, %cst_51 [1] : vector<8x8xf32> to vector<8xf32>
    %154 = vector.shape_cast %153 : vector<8xf32> to vector<8x1xf32>
    %155 = vector.broadcast %154 : vector<8x1xf32> to vector<8x8xf32>
    %156 = arith.subf %152, %155 : vector<8x8xf32>
    %157 = math.exp %156 : vector<8x8xf32>
    %cst_52 = arith.constant dense<0.000000e+00> : vector<8xf32>
    %158 = vector.multi_reduction <add>, %157, %cst_52 [1] : vector<8x8xf32> to vector<8xf32>
    %159 = vector.shape_cast %158 : vector<8xf32> to vector<8x1xf32>
    %160 = tpu.reciprocal %159 {approx = true} : vector<8x1xf32> -> vector<8x1xf32>
    %161 = vector.broadcast %160 : vector<8x1xf32> to vector<8x8xf32>
    %162 = arith.mulf %157, %161 : vector<8x8xf32>
    %163 = arith.truncf %162 : vector<8x8xf32> to vector<8x8xbf16>
    %cst_53 = arith.constant dense<0.000000e+00> : vector<8x8xf32>
    %164 = tpu.matmul %163, %149, %cst_53 {dimension_numbers = #tpu.dot_dimension_numbers<[1], [0], [0], [1], [0, 0, 1, 1], [], []>} : vector<8x8xbf16>, vector<8x8xbf16>, vector<8x8xf32> -> vector<8x8xf32>
    %165 = arith.truncf %164 : vector<8x8xf32> to vector<8x8xbf16>
    %c8_54 = arith.constant 8 : index
    %c0_55 = arith.constant 0 : index
    %166 = vector.load %arg20[%c8_54, %c0_55] : memref<16x32xbf16, #tpu.memory_space<vmem>>, vector<8x8xbf16>
    tpu.vector_store %arg20[%c8_54, %c0_55], %165 {strides = array<i32>} : memref<16x32xbf16, #tpu.memory_space<vmem>>, vector<8x8xbf16>,
    %167 = vector.extract_strided_slice %37 {offsets = [8, 8], sizes = [8, 8], strides = [1, 1]} : vector<16x96xf32> to vector<8x8xf32>
    %cst_56 = arith.constant 0.353553385 : f32
    %168 = vector.broadcast %cst_56 : f32 to vector<8x8xf32>
    %169 = arith.mulf %167, %168 : vector<8x8xf32>
    %170 = arith.truncf %169 : vector<8x8xf32> to vector<8x8xbf16>
    %171 = vector.extract_strided_slice %37 {offsets = [8, 40], sizes = [8, 8], strides = [1, 1]} : vector<16x96xf32> to vector<8x8xf32>
    %172 = arith.truncf %171 : vector<8x8xf32> to vector<8x8xbf16>
    %173 = vector.extract_strided_slice %37 {offsets = [8, 72], sizes = [8, 8], strides = [1, 1]} : vector<16x96xf32> to vector<8x8xf32>
    %174 = arith.truncf %173 : vector<8x8xf32> to vector<8x8xbf16>
    %cst_57 = arith.constant dense<0.000000e+00> : vector<8x8xf32>
    %175 = tpu.matmul %170, %172, %cst_57 {dimension_numbers = #tpu.dot_dimension_numbers<[1], [1], [0], [0], [0, 0, 1, 0], [], []>} : vector<8x8xbf16>, vector<8x8xbf16>, vector<8x8xf32> -> vector<8x8xf32>
    %176 = vector.broadcast %141 : vector<1x8xf32> to vector<8x8xf32>
    %177 = arith.addf %175, %176 : vector<8x8xf32>
    %cst_58 = arith.constant dense<0xFF800000> : vector<8xf32>
    %178 = vector.multi_reduction <maximumf>, %177, %cst_58 [1] : vector<8x8xf32> to vector<8xf32>
    %179 = vector.shape_cast %178 : vector<8xf32> to vector<8x1xf32>
    %180 = vector.broadcast %179 : vector<8x1xf32> to vector<8x8xf32>
    %181 = arith.subf %177, %180 : vector<8x8xf32>
    %182 = math.exp %181 : vector<8x8xf32>
    %cst_59 = arith.constant dense<0.000000e+00> : vector<8xf32>
    %183 = vector.multi_reduction <add>, %182, %cst_59 [1] : vector<8x8xf32> to vector<8xf32>
    %184 = vector.shape_cast %183 : vector<8xf32> to vector<8x1xf32>
    %185 = tpu.reciprocal %184 {approx = true} : vector<8x1xf32> -> vector<8x1xf32>
    %186 = vector.broadcast %185 : vector<8x1xf32> to vector<8x8xf32>
    %187 = arith.mulf %182, %186 : vector<8x8xf32>
    %188 = arith.truncf %187 : vector<8x8xf32> to vector<8x8xbf16>
    %cst_60 = arith.constant dense<0.000000e+00> : vector<8x8xf32>
    %189 = tpu.matmul %188, %174, %cst_60 {dimension_numbers = #tpu.dot_dimension_numbers<[1], [0], [0], [1], [0, 0, 1, 1], [], []>} : vector<8x8xbf16>, vector<8x8xbf16>, vector<8x8xf32> -> vector<8x8xf32>
    %190 = arith.truncf %189 : vector<8x8xf32> to vector<8x8xbf16>
    %c8_61 = arith.constant 8 : index
    %c8_62 = arith.constant 8 : index
    %191 = vector.load %arg20[%c8_61, %c8_62] : memref<16x32xbf16, #tpu.memory_space<vmem>>, vector<8x8xbf16>
    tpu.vector_store %arg20[%c8_61, %c8_62], %190 {strides = array<i32>} : memref<16x32xbf16, #tpu.memory_space<vmem>>, vector<8x8xbf16>,
    %192 = vector.extract_strided_slice %37 {offsets = [8, 16], sizes = [8, 8], strides = [1, 1]} : vector<16x96xf32> to vector<8x8xf32>
    %cst_63 = arith.constant 0.353553385 : f32
    %193 = vector.broadcast %cst_63 : f32 to vector<8x8xf32>
    %194 = arith.mulf %192, %193 : vector<8x8xf32>
    %195 = arith.truncf %194 : vector<8x8xf32> to vector<8x8xbf16>
    %196 = vector.extract_strided_slice %37 {offsets = [8, 48], sizes = [8, 8], strides = [1, 1]} : vector<16x96xf32> to vector<8x8xf32>
    %197 = arith.truncf %196 : vector<8x8xf32> to vector<8x8xbf16>
    %198 = vector.extract_strided_slice %37 {offsets = [8, 80], sizes = [8, 8], strides = [1, 1]} : vector<16x96xf32> to vector<8x8xf32>
    %199 = arith.truncf %198 : vector<8x8xf32> to vector<8x8xbf16>
    %cst_64 = arith.constant dense<0.000000e+00> : vector<8x8xf32>
    %200 = tpu.matmul %195, %197, %cst_64 {dimension_numbers = #tpu.dot_dimension_numbers<[1], [1], [0], [0], [0, 0, 1, 0], [], []>} : vector<8x8xbf16>, vector<8x8xbf16>, vector<8x8xf32> -> vector<8x8xf32>
    %201 = vector.broadcast %141 : vector<1x8xf32> to vector<8x8xf32>
    %202 = arith.addf %200, %201 : vector<8x8xf32>
    %cst_65 = arith.constant dense<0xFF800000> : vector<8xf32>
    %203 = vector.multi_reduction <maximumf>, %202, %cst_65 [1] : vector<8x8xf32> to vector<8xf32>
    %204 = vector.shape_cast %203 : vector<8xf32> to vector<8x1xf32>
    %205 = vector.broadcast %204 : vector<8x1xf32> to vector<8x8xf32>
    %206 = arith.subf %202, %205 : vector<8x8xf32>
    %207 = math.exp %206 : vector<8x8xf32>
    %cst_66 = arith.constant dense<0.000000e+00> : vector<8xf32>
    %208 = vector.multi_reduction <add>, %207, %cst_66 [1] : vector<8x8xf32> to vector<8xf32>
    %209 = vector.shape_cast %208 : vector<8xf32> to vector<8x1xf32>
    %210 = tpu.reciprocal %209 {approx = true} : vector<8x1xf32> -> vector<8x1xf32>
    %211 = vector.broadcast %210 : vector<8x1xf32> to vector<8x8xf32>
    %212 = arith.mulf %207, %211 : vector<8x8xf32>
    %213 = arith.truncf %212 : vector<8x8xf32> to vector<8x8xbf16>
    %cst_67 = arith.constant dense<0.000000e+00> : vector<8x8xf32>
    %214 = tpu.matmul %213, %199, %cst_67 {dimension_numbers = #tpu.dot_dimension_numbers<[1], [0], [0], [1], [0, 0, 1, 1], [], []>} : vector<8x8xbf16>, vector<8x8xbf16>, vector<8x8xf32> -> vector<8x8xf32>
    %215 = arith.truncf %214 : vector<8x8xf32> to vector<8x8xbf16>
    %c8_68 = arith.constant 8 : index
    %c16_69 = arith.constant 16 : index
    %216 = vector.load %arg20[%c8_68, %c16_69] : memref<16x32xbf16, #tpu.memory_space<vmem>>, vector<8x8xbf16>
    tpu.vector_store %arg20[%c8_68, %c16_69], %215 {strides = array<i32>} : memref<16x32xbf16, #tpu.memory_space<vmem>>, vector<8x8xbf16>,
    %217 = vector.extract_strided_slice %37 {offsets = [8, 24], sizes = [8, 8], strides = [1, 1]} : vector<16x96xf32> to vector<8x8xf32>
    %cst_70 = arith.constant 0.353553385 : f32
    %218 = vector.broadcast %cst_70 : f32 to vector<8x8xf32>
    %219 = arith.mulf %217, %218 : vector<8x8xf32>
    %220 = arith.truncf %219 : vector<8x8xf32> to vector<8x8xbf16>
    %221 = vector.extract_strided_slice %37 {offsets = [8, 56], sizes = [8, 8], strides = [1, 1]} : vector<16x96xf32> to vector<8x8xf32>
    %222 = arith.truncf %221 : vector<8x8xf32> to vector<8x8xbf16>
    %223 = vector.extract_strided_slice %37 {offsets = [8, 88], sizes = [8, 8], strides = [1, 1]} : vector<16x96xf32> to vector<8x8xf32>
    %224 = arith.truncf %223 : vector<8x8xf32> to vector<8x8xbf16>
    %cst_71 = arith.constant dense<0.000000e+00> : vector<8x8xf32>
    %225 = tpu.matmul %220, %222, %cst_71 {dimension_numbers = #tpu.dot_dimension_numbers<[1], [1], [0], [0], [0, 0, 1, 0], [], []>} : vector<8x8xbf16>, vector<8x8xbf16>, vector<8x8xf32> -> vector<8x8xf32>
    %226 = vector.broadcast %141 : vector<1x8xf32> to vector<8x8xf32>
    %227 = arith.addf %225, %226 : vector<8x8xf32>
    %cst_72 = arith.constant dense<0xFF800000> : vector<8xf32>
    %228 = vector.multi_reduction <maximumf>, %227, %cst_72 [1] : vector<8x8xf32> to vector<8xf32>
    %229 = vector.shape_cast %228 : vector<8xf32> to vector<8x1xf32>
    %230 = vector.broadcast %229 : vector<8x1xf32> to vector<8x8xf32>
    %231 = arith.subf %227, %230 : vector<8x8xf32>
    %232 = math.exp %231 : vector<8x8xf32>
    %cst_73 = arith.constant dense<0.000000e+00> : vector<8xf32>
    %233 = vector.multi_reduction <add>, %232, %cst_73 [1] : vector<8x8xf32> to vector<8xf32>
    %234 = vector.shape_cast %233 : vector<8xf32> to vector<8x1xf32>
    %235 = tpu.reciprocal %234 {approx = true} : vector<8x1xf32> -> vector<8x1xf32>
    %236 = vector.broadcast %235 : vector<8x1xf32> to vector<8x8xf32>
    %237 = arith.mulf %232, %236 : vector<8x8xf32>
    %238 = arith.truncf %237 : vector<8x8xf32> to vector<8x8xbf16>
    %cst_74 = arith.constant dense<0.000000e+00> : vector<8x8xf32>
    %239 = tpu.matmul %238, %224, %cst_74 {dimension_numbers = #tpu.dot_dimension_numbers<[1], [0], [0], [1], [0, 0, 1, 1], [], []>} : vector<8x8xbf16>, vector<8x8xbf16>, vector<8x8xf32> -> vector<8x8xf32>
    %240 = arith.truncf %239 : vector<8x8xf32> to vector<8x8xbf16>
    %c8_75 = arith.constant 8 : index
    %c24_76 = arith.constant 24 : index
    %241 = vector.load %arg20[%c8_75, %c24_76] : memref<16x32xbf16, #tpu.memory_space<vmem>>, vector<8x8xbf16>
    tpu.vector_store %arg20[%c8_75, %c24_76], %240 {strides = array<i32>} : memref<16x32xbf16, #tpu.memory_space<vmem>>, vector<8x8xbf16>,
    %c0_77 = arith.constant 0 : index
    %c0_78 = arith.constant 0 : index
    %242 = vector.load %arg20[%c0_77, %c0_78] : memref<16x32xbf16, #tpu.memory_space<vmem>>, vector<16x32xbf16>
    %c0_79 = arith.constant 0 : index
    %c0_80 = arith.constant 0 : index
    %c0_81 = arith.constant 0 : index
    %243 = vector.load %arg8[%c0_79, %c0_80, %c0_81] : memref<1x32x32xbf16, #tpu.memory_space<vmem>>, vector<1x32x32xbf16>
    %244 = vector.shape_cast %243 : vector<1x32x32xbf16> to vector<32x32xbf16>
    %cst_82 = arith.constant dense<0.000000e+00> : vector<16x32xf32>
    %245 = tpu.matmul %242, %244, %cst_82 {dimension_numbers = #tpu.dot_dimension_numbers<[1], [0], [0], [1], [0, 0, 1, 1], [], []>} : vector<16x32xbf16>, vector<32x32xbf16>, vector<16x32xf32> -> vector<16x32xf32>
    %c0_83 = arith.constant 0 : index
    %c0_84 = arith.constant 0 : index
    %c0_85 = arith.constant 0 : index
    %246 = vector.load %arg9[%c0_83, %c0_84, %c0_85] : memref<1x1x32xf32, #tpu.memory_space<vmem>>, vector<1x1x32xf32>
    %247 = vector.shape_cast %246 : vector<1x1x32xf32> to vector<1x32xf32>
    %248 = vector.broadcast %247 : vector<1x32xf32> to vector<16x32xf32>
    %249 = arith.addf %245, %248 : vector<16x32xf32>
    %250 = arith.addf %3, %249 : vector<16x32xf32>
    %c0_86 = arith.constant 0 : index
    %c0_87 = arith.constant 0 : index
    %c0_88 = arith.constant 0 : index
    %251 = vector.load %arg10[%c0_86, %c0_87, %c0_88] : memref<1x1x32xf32, #tpu.memory_space<vmem>>, vector<1x1x32xf32>
    %252 = vector.shape_cast %251 : vector<1x1x32xf32> to vector<1x32xf32>
    %c0_89 = arith.constant 0 : index
    %c0_90 = arith.constant 0 : index
    %c0_91 = arith.constant 0 : index
    %253 = vector.load %arg11[%c0_89, %c0_90, %c0_91] : memref<1x1x32xf32, #tpu.memory_space<vmem>>, vector<1x1x32xf32>
    %254 = vector.shape_cast %253 : vector<1x1x32xf32> to vector<1x32xf32>
    %cst_92 = arith.constant dense<0.000000e+00> : vector<16xf32>
    %255 = vector.multi_reduction <add>, %250, %cst_92 [1] : vector<16x32xf32> to vector<16xf32>
    %256 = vector.shape_cast %255 : vector<16xf32> to vector<16x1xf32>
    %cst_93 = arith.constant 3.200000e+01 : f32
    %257 = vector.broadcast %cst_93 : f32 to vector<16x1xf32>
    %258 = arith.divf %256, %257 : vector<16x1xf32>
    %259 = vector.broadcast %258 : vector<16x1xf32> to vector<16x32xf32>
    %260 = arith.subf %250, %259 : vector<16x32xf32>
    %261 = arith.mulf %260, %260 : vector<16x32xf32>
    %cst_94 = arith.constant dense<0.000000e+00> : vector<16xf32>
    %262 = vector.multi_reduction <add>, %261, %cst_94 [1] : vector<16x32xf32> to vector<16xf32>
    %263 = vector.shape_cast %262 : vector<16xf32> to vector<16x1xf32>
    %cst_95 = arith.constant 3.200000e+01 : f32
    %264 = vector.broadcast %cst_95 : f32 to vector<16x1xf32>
    %265 = arith.divf %263, %264 : vector<16x1xf32>
    %266 = vector.broadcast %258 : vector<16x1xf32> to vector<16x32xf32>
    %267 = arith.subf %250, %266 : vector<16x32xf32>
    %cst_96 = arith.constant 9.99999974E-6 : f32
    %268 = vector.broadcast %cst_96 : f32 to vector<16x1xf32>
    %269 = arith.addf %265, %268 : vector<16x1xf32>
    %270 = math.rsqrt %269 : vector<16x1xf32>
    %271 = vector.broadcast %270 : vector<16x1xf32> to vector<16x32xf32>
    %272 = arith.mulf %267, %271 : vector<16x32xf32>
    %273 = vector.broadcast %252 : vector<1x32xf32> to vector<16x32xf32>
    %274 = arith.mulf %272, %273 : vector<16x32xf32>
    %275 = vector.broadcast %254 : vector<1x32xf32> to vector<16x32xf32>
    %276 = arith.addf %274, %275 : vector<16x32xf32>
    %277 = arith.truncf %276 : vector<16x32xf32> to vector<16x32xbf16>
    %c0_97 = arith.constant 0 : index
    %c0_98 = arith.constant 0 : index
    %c0_99 = arith.constant 0 : index
    %278 = vector.load %arg12[%c0_97, %c0_98, %c0_99] : memref<1x32x64xbf16, #tpu.memory_space<vmem>>, vector<1x32x64xbf16>
    %279 = vector.shape_cast %278 : vector<1x32x64xbf16> to vector<32x64xbf16>
    %cst_100 = arith.constant dense<0.000000e+00> : vector<16x64xf32>
    %280 = tpu.matmul %277, %279, %cst_100 {dimension_numbers = #tpu.dot_dimension_numbers<[1], [0], [0], [1], [0, 0, 1, 1], [], []>} : vector<16x32xbf16>, vector<32x64xbf16>, vector<16x64xf32> -> vector<16x64xf32>
    %c0_101 = arith.constant 0 : index
    %c0_102 = arith.constant 0 : index
    %c0_103 = arith.constant 0 : index
    %281 = vector.load %arg13[%c0_101, %c0_102, %c0_103] : memref<1x1x64xf32, #tpu.memory_space<vmem>>, vector<1x1x64xf32>
    %282 = vector.shape_cast %281 : vector<1x1x64xf32> to vector<1x64xf32>
    %283 = vector.broadcast %282 : vector<1x64xf32> to vector<16x64xf32>
    %284 = arith.addf %280, %283 : vector<16x64xf32>
    %cst_104 = arith.constant 0.000000e+00 : f32
    %285 = vector.broadcast %cst_104 : f32 to vector<16x64xf32>
    %286 = arith.maximumf %284, %285 : vector<16x64xf32>
    %287 = arith.truncf %286 : vector<16x64xf32> to vector<16x64xbf16>
    %c0_105 = arith.constant 0 : index
    %c0_106 = arith.constant 0 : index
    %c0_107 = arith.constant 0 : index
    %288 = vector.load %arg14[%c0_105, %c0_106, %c0_107] : memref<1x64x32xbf16, #tpu.memory_space<vmem>>, vector<1x64x32xbf16>
    %289 = vector.shape_cast %288 : vector<1x64x32xbf16> to vector<64x32xbf16>
    %cst_108 = arith.constant dense<0.000000e+00> : vector<16x32xf32>
    %290 = tpu.matmul %287, %289, %cst_108 {dimension_numbers = #tpu.dot_dimension_numbers<[1], [0], [0], [1], [0, 0, 1, 1], [], []>} : vector<16x64xbf16>, vector<64x32xbf16>, vector<16x32xf32> -> vector<16x32xf32>
    %291 = arith.addf %250, %290 : vector<16x32xf32>
    %c0_109 = arith.constant 0 : index
    %c0_110 = arith.constant 0 : index
    %c0_111 = arith.constant 0 : index
    %292 = vector.load %arg15[%c0_109, %c0_110, %c0_111] : memref<1x1x32xf32, #tpu.memory_space<vmem>>, vector<1x1x32xf32>
    %293 = vector.shape_cast %292 : vector<1x1x32xf32> to vector<1x32xf32>
    %294 = vector.broadcast %293 : vector<1x32xf32> to vector<16x32xf32>
    %295 = arith.addf %291, %294 : vector<16x32xf32>
    %c0_112 = arith.constant 0 : index
    %c0_113 = arith.constant 0 : index
    %296 = vector.load %arg19[%c0_112, %c0_113] : memref<16x32xf32, #tpu.memory_space<vmem>>, vector<16x32xf32>
    tpu.vector_store %arg19[%c0_112, %c0_113], %295 {strides = array<i32>} : memref<16x32xf32, #tpu.memory_space<vmem>>, vector<16x32xf32>,
    %c1_i32 = arith.constant 1 : i32
    %297 = arith.cmpi eq, %arg1, %c1_i32 : i32
    %298 = arith.extui %297 : i1 to i32
    %c0_i32_114 = arith.constant 0 : i32
    %299 = arith.cmpi ne, %298, %c0_i32_114 : i32
    scf.if %299 {
      %c0_115 = arith.constant 0 : index
      %c0_116 = arith.constant 0 : index
      %300 = vector.load %arg16[%c0_115, %c0_116] : memref<1x32xf32, #tpu.memory_space<vmem>>, vector<1x32xf32>
      %c0_117 = arith.constant 0 : index
      %c0_118 = arith.constant 0 : index
      %301 = vector.load %arg17[%c0_117, %c0_118] : memref<1x32xf32, #tpu.memory_space<vmem>>, vector<1x32xf32>
      %cst_119 = arith.constant dense<0.000000e+00> : vector<16xf32>
      %302 = vector.multi_reduction <add>, %295, %cst_119 [1] : vector<16x32xf32> to vector<16xf32>
      %303 = vector.shape_cast %302 : vector<16xf32> to vector<16x1xf32>
      %cst_120 = arith.constant 3.200000e+01 : f32
      %304 = vector.broadcast %cst_120 : f32 to vector<16x1xf32>
      %305 = arith.divf %303, %304 : vector<16x1xf32>
      %306 = vector.broadcast %305 : vector<16x1xf32> to vector<16x32xf32>
      %307 = arith.subf %295, %306 : vector<16x32xf32>
      %308 = arith.mulf %307, %307 : vector<16x32xf32>
      %cst_121 = arith.constant dense<0.000000e+00> : vector<16xf32>
      %309 = vector.multi_reduction <add>, %308, %cst_121 [1] : vector<16x32xf32> to vector<16xf32>
      %310 = vector.shape_cast %309 : vector<16xf32> to vector<16x1xf32>
      %cst_122 = arith.constant 3.200000e+01 : f32
      %311 = vector.broadcast %cst_122 : f32 to vector<16x1xf32>
      %312 = arith.divf %310, %311 : vector<16x1xf32>
      %313 = vector.broadcast %305 : vector<16x1xf32> to vector<16x32xf32>
      %314 = arith.subf %295, %313 : vector<16x32xf32>
      %cst_123 = arith.constant 9.99999974E-6 : f32
      %315 = vector.broadcast %cst_123 : f32 to vector<16x1xf32>
      %316 = arith.addf %312, %315 : vector<16x1xf32>
      %317 = math.rsqrt %316 : vector<16x1xf32>
      %318 = vector.broadcast %317 : vector<16x1xf32> to vector<16x32xf32>
      %319 = arith.mulf %314, %318 : vector<16x32xf32>
      %320 = vector.broadcast %300 : vector<1x32xf32> to vector<16x32xf32>
      %321 = arith.mulf %319, %320 : vector<16x32xf32>
      %322 = vector.broadcast %301 : vector<1x32xf32> to vector<16x32xf32>
      %323 = arith.addf %321, %322 : vector<16x32xf32>
      %324 = vector.shape_cast %323 : vector<16x32xf32> to vector<2x8x32xf32>
      %c0_124 = arith.constant 0 : index
      %c0_125 = arith.constant 0 : index
      %c0_126 = arith.constant 0 : index
      %325 = vector.load %arg18[%c0_124, %c0_125, %c0_126] : memref<2x8x32xf32, #tpu.memory_space<vmem>>, vector<2x8x32xf32>
      tpu.vector_store %arg18[%c0_124, %c0_125, %c0_126], %324 {strides = array<i32>} : memref<2x8x32xf32, #tpu.memory_space<vmem>>, vector<2x8x32xf32>,
    } else {
    }
    return
  }
  func.func @transform_0(%arg0: i32, %arg1: i32) -> (i32, i32, i32) {
    %c0_i32 = arith.constant 0 : i32
    %c0_i32_0 = arith.constant 0 : i32
    %c0_i32_1 = arith.constant 0 : i32
    return %arg0, %c0_i32, %c0_i32_0 : i32, i32, i32
  }
  func.func @transform_1(%arg0: i32, %arg1: i32) -> (i32, i32, i32) {
    %c0_i32 = arith.constant 0 : i32
    %c0_i32_0 = arith.constant 0 : i32
    %c0_i32_1 = arith.constant 0 : i32
    return %arg0, %c0_i32, %c0_i32_0 : i32, i32, i32
  }
  func.func @transform_2(%arg0: i32, %arg1: i32) -> (i32, i32, i32) {
    %c0_i32 = arith.constant 0 : i32
    %c0_i32_0 = arith.constant 0 : i32
    %c0_i32_1 = arith.constant 0 : i32
    return %arg1, %c0_i32, %c0_i32_0 : i32, i32, i32
  }
  func.func @transform_3(%arg0: i32, %arg1: i32) -> (i32, i32, i32) {
    %c0_i32 = arith.constant 0 : i32
    %c0_i32_0 = arith.constant 0 : i32
    %c0_i32_1 = arith.constant 0 : i32
    return %arg1, %c0_i32, %c0_i32_0 : i32, i32, i32
  }
  func.func @transform_4(%arg0: i32, %arg1: i32) -> (i32, i32, i32) {
    %c0_i32 = arith.constant 0 : i32
    %c0_i32_0 = arith.constant 0 : i32
    %c0_i32_1 = arith.constant 0 : i32
    return %arg1, %c0_i32, %c0_i32_0 : i32, i32, i32
  }
  func.func @transform_5(%arg0: i32, %arg1: i32) -> (i32, i32, i32) {
    %c0_i32 = arith.constant 0 : i32
    %c0_i32_0 = arith.constant 0 : i32
    %c0_i32_1 = arith.constant 0 : i32
    return %arg1, %c0_i32, %c0_i32_0 : i32, i32, i32
  }
  func.func @transform_6(%arg0: i32, %arg1: i32) -> (i32, i32, i32) {
    %c0_i32 = arith.constant 0 : i32
    %c0_i32_0 = arith.constant 0 : i32
    %c0_i32_1 = arith.constant 0 : i32
    return %arg1, %c0_i32, %c0_i32_0 : i32, i32, i32
  }
  func.func @transform_7(%arg0: i32, %arg1: i32) -> (i32, i32, i32) {
    %c0_i32 = arith.constant 0 : i32
    %c0_i32_0 = arith.constant 0 : i32
    %c0_i32_1 = arith.constant 0 : i32
    return %arg1, %c0_i32, %c0_i32_0 : i32, i32, i32
  }
  func.func @transform_8(%arg0: i32, %arg1: i32) -> (i32, i32, i32) {
    %c0_i32 = arith.constant 0 : i32
    %c0_i32_0 = arith.constant 0 : i32
    %c0_i32_1 = arith.constant 0 : i32
    return %arg1, %c0_i32, %c0_i32_0 : i32, i32, i32
  }
  func.func @transform_9(%arg0: i32, %arg1: i32) -> (i32, i32, i32) {
    %c0_i32 = arith.constant 0 : i32
    %c0_i32_0 = arith.constant 0 : i32
    %c0_i32_1 = arith.constant 0 : i32
    return %arg1, %c0_i32, %c0_i32_0 : i32, i32, i32
  }
  func.func @transform_10(%arg0: i32, %arg1: i32) -> (i32, i32, i32) {
    %c0_i32 = arith.constant 0 : i32
    %c0_i32_0 = arith.constant 0 : i32
    %c0_i32_1 = arith.constant 0 : i32
    return %arg1, %c0_i32, %c0_i32_0 : i32, i32, i32
  }
  func.func @transform_11(%arg0: i32, %arg1: i32) -> (i32, i32, i32) {
    %c0_i32 = arith.constant 0 : i32
    %c0_i32_0 = arith.constant 0 : i32
    %c0_i32_1 = arith.constant 0 : i32
    return %arg1, %c0_i32, %c0_i32_0 : i32, i32, i32
  }
  func.func @transform_12(%arg0: i32, %arg1: i32) -> (i32, i32, i32) {
    %c0_i32 = arith.constant 0 : i32
    %c0_i32_0 = arith.constant 0 : i32
    %c0_i32_1 = arith.constant 0 : i32
    return %arg1, %c0_i32, %c0_i32_0 : i32, i32, i32
  }
  func.func @transform_13(%arg0: i32, %arg1: i32) -> (i32, i32, i32) {
    %c0_i32 = arith.constant 0 : i32
    %c0_i32_0 = arith.constant 0 : i32
    %c0_i32_1 = arith.constant 0 : i32
    return %arg1, %c0_i32, %c0_i32_0 : i32, i32, i32
  }
  func.func @transform_14(%arg0: i32, %arg1: i32) -> (i32, i32) {
    %c0_i32 = arith.constant 0 : i32
    %c0_i32_0 = arith.constant 0 : i32
    %c0_i32_1 = arith.constant 0 : i32
    return %c0_i32, %c0_i32_0 : i32, i32
  }
  func.func @transform_15(%arg0: i32, %arg1: i32) -> (i32, i32) {
    %c0_i32 = arith.constant 0 : i32
    %c0_i32_0 = arith.constant 0 : i32
    %c0_i32_1 = arith.constant 0 : i32
    return %c0_i32, %c0_i32_0 : i32, i32
  }
  func.func @transform_16(%arg0: i32, %arg1: i32) -> (i32, i32, i32) {
    %c0_i32 = arith.constant 0 : i32
    %c0_i32_0 = arith.constant 0 : i32
    %c0_i32_1 = arith.constant 0 : i32
    return %arg0, %c0_i32, %c0_i32_0 : i32, i32, i32
  }
}

</mosaic_0001>

<bundles_post_ra>
// kernel: tpu_custom_call.1
= control target key start
LH: loop header
LB: loop body
LE: loop exit
PB: predicated region body
PF: predicated region fallthrough
CT: control target
= control target key end

     0   :  { %s3401_s0 = inlined_call_operand.hbm [shape: f32[2,1,8], index: 0, kind: input, shape index: {}]   ;;  %s3402_s1 = inlined_call_operand.hbm [shape: f32[2,8,32], index: 1, kind: input, shape index: {}]   ;;  %s3403_s2 = inlined_call_operand.vmem [shape: f32[2,1,32], index: 2, kind: input, shape index: {}]   ;;  %s3404_s3 = inlined_call_operand.vmem [shape: f32[2,1,32], index: 3, kind: input, shape index: {}]   ;;  %s3405_s4 = inlined_call_operand.vmem [shape: bf16[2,32,96], index: 4, kind: input, shape index: {}]   ;;  %s3406_s5 = inlined_call_operand.vmem [shape: f32[2,1,96], index: 5, kind: input, shape index: {}]   ;;  %s3407_s6 = inlined_call_operand.vmem [shape: bf16[2,32,32], index: 6, kind: input, shape index: {}]   ;;  %s3408_s7 = inlined_call_operand.vmem [shape: f32[2,1,32], index: 7, kind: input, shape index: {}]   ;;  %s3409_s8 = inlined_call_operand.vmem [shape: f32[2,1,32], index: 8, kind: input, shape index: {}]   ;;  %s3410_s9 = inlined_call_operand.vmem [shape: f32[2,1,32], index: 9, kind: input, shape index: {}]   ;;  %s3411_s10 = inlined_call_operand.vmem [shape: bf16[2,32,64], index: 10, kind: input, shape index: {}]   ;;  %s3412_s11 = inlined_call_operand.vmem [shape: f32[2,1,64], index: 11, kind: input, shape index: {}]   ;;  %s3413_s12 = inlined_call_operand.vmem [shape: bf16[2,64,32], index: 12, kind: input, shape index: {}]   ;;  %s3414_s13 = inlined_call_operand.vmem [shape: f32[2,1,32], index: 13, kind: input, shape index: {}]   ;;  %s3415_s14 = inlined_call_operand.vmem [shape: f32[1,32], index: 14, kind: input, shape index: {}]   ;;  %s3416_s15 = inlined_call_operand.vmem [shape: f32[1,32], index: 15, kind: input, shape index: {}]   ;;  %s3417_s16 = inlined_call_operand.hbm [shape: f32[2,8,32], index: 16, kind: output, shape index: {}]  }
   0x1   :  { %3421 = sst [smem:[#allocation16_spill]] %s3401_s0 }
   0x2   :  { %3422 = sst [smem:[#allocation17_spill]] %s3402_s1 }
   0x3   :  { %3423 = sst [smem:[#allocation18_spill]] %s3405_s4 }
   0x4   :  { %3424 = sst [smem:[#allocation19_spill]] %s3407_s6 }
   0x5   :  { %3425 = sst [smem:[#allocation20_spill]] %s3415_s14 }
   0x6   :  { %3426 = sst [smem:[#allocation21_spill]] %s3416_s15 }
   0x7   :  { %3427 = sst [smem:[#allocation22_spill]] %s3417_s16 }
   0x8   :  { %21 = vsyncpa [#allocation5], 0 }
   0x9   :  { %22 = vsyncpa [#allocation8], 0 }
   0xa   :  { %23 = vsyncpa [#allocation6], 0  ;;  %s2966_s21 = smov 0   ;;  %s2968_s22 = smov 0  }
   0xb   :  { %s2970_s23 = smov 0  }
   0xc LB: > { %3428 = sst [smem:[#allocation13_spill]] %s2851_s22  ;;  %s3418_s24 = sadd.s32 4294967295, %s2855_s23   ;;  %s2855_s23 = sphi %s2970_s23, %s29_s23   ;;  %s2851_s22 = sphi %s2968_s22, %s3450_s22   ;;  %s2847_s21 = sphi %s2966_s21, %s3449_s21  }
   0xd   : > { %3429 = sst [smem:[#allocation14_spill]] %s2855_s23  ;;  %s38_s25 = sadd.s32 1, %s2851_s22 }
   0xe   : > { %p39_p0 = scmp.ge.s32.totalorder %s38_s25, 2  ;;  %p2359_p1 = scmp.ge.s32.totalorder %s2855_s23, 1 }
   0xf   : > { %p478_p2 = scmp.lt.s32.totalorder %s2855_s23, 3  ;;  %p2993_p4 = scmp.eq.s32.totalorder %s3418_s24, 0 }
  0x10   : > { %s3452_s25 = smov (%p39_p0, %s38_s25), 0  ;;  %s2857_s28 = smov [#allocation4]  }
  0x11   : > { %3430 = sst [smem:[#allocation15_spill]] %s3452_s25  ;;  %p2987_p3 = pnand %p2359_p1, %p478_p2 }
  0x12   : > { %s493_s29 = sshll.u32 %s2857_s28, 4  ;;  %s2858_s0 = smov [#allocation7]   ;;  %s494_s29 = int_to_ptr.vmem [resolvable:$true] %s493_s29 }
  0x13   : > { %p2629_p5 = pneg %p2987_p3  ;;  %s509_s17 = sshll.u32 %s2858_s0, 4  ;;  %s510_s17 = int_to_ptr.vmem [resolvable:$true] %s509_s17 }
  0x14   : > { %s2756_s18 = scalar_lea.vmem %s494_s29, 32  ;;  %p2764_p11 = scmp.lt.s32.totalorder %s494_s29, %s494_s29 }
  0x15   : > { %p3001_p6 = pnand %p2993_p4, %p2629_p5  ;;  %p2757_p8 = scmp.ne.s32.totalorder %s494_s29, %s2756_s18 }
  0x16   : > { %p2765_p12 = scmp.lt.s32.totalorder %s2756_s18, %s2756_s18 }
  0x17   : > { %p2747_p7 = pneg %p3001_p6 }
  0x18   : > { %p2766_p13 = por %p2765_p12, %p2764_p11 }
  0x19   : > { %p2759_p9 = pnand %p2757_p8, %p2747_p7 }
  0x1b   : > { %p2760_p10 = pneg %p2759_p9 }
  0x1d   : > { %p2767_p0 = pnand %p2766_p13, %p2760_p10 }
  0x1f   : > { %2770 = shalt.err (!%p2767_p0)
}
  0x20   : > { %s2859_s19 = smov 16   ;;  %s2860_s20 = smov 1  }
  0x21   : > { %s3434_s24 = sld [smem:[#allocation16_spill]]  ;;  %s2782_s25 = scalar_lea.vmem %s510_s17, 256 }
  0x22   : > { %p2783_p1 = scmp.ne.s32.totalorder %s510_s17, %s2782_s25  ;;  %p2790_p8 = scmp.lt.s32.totalorder %s510_s17, %s510_s17 }
  0x23   : > { %p2791_p9 = scmp.lt.s32.totalorder %s2782_s25, %s2782_s25 }
  0x24   : > { %p2785_p2 = pnand %p2783_p1, %p2747_p7 }
  0x25   : > { %p2792_p11 = por %p2791_p9, %p2790_p8 }
  0x26   : > { %p2786_p5 = pneg %p2785_p2 }
  0x27   : > { %2632 = dma.hbm_to_vmem [thread:$0]  (!%p3001_p6), %s3434_s24, 32, %s494_s29, [#allocation5], %s2859_s19, %s2859_s19, %s2860_s20  }
  0x28   : > { %p2793_p10 = pnand %p2792_p11, %p2786_p5 }
  0x2a   : > { %2796 = shalt.err (!%p2793_p10)
}
  0x2b   : > { %s2861_s18 = smov 128   ;;  %s2862_s22 = smov 8  }
  0x2c   : > { %s3435_s1 = sld [smem:[#allocation17_spill]] }
  0x2e   : > { %611 = sbr.rel (%p2987_p3) target bundleno = 2914 (0xb62), region = 84 }
  0x32   : > { %2635 = dma.hbm_to_vmem [thread:$0]  (!%p3001_p6), %s3435_s1, 256, %s510_s17, [#allocation8], %s2861_s18, %s2861_s18, %s2862_s22  }
  0x33   : > { %2834 = dma.done.wait (%p2993_p4), [#allocation5], 32  }
  0x34   : > { %2836 = vsyncadd (%p2993_p4), [#allocation5], 4294967264 }
  0x35   : > { %2838 = dma.done.wait (%p2993_p4), [#allocation8], 256  }
  0x36   : > { %2840 = vsyncadd (%p2993_p4), [#allocation8], 4294967040  ;;  %p701_p7 = scmp.lt.s32.totalorder %s2847_s21, 1  ;;  %s3436_s4 = sld [smem:[#allocation18_spill]] }
  0x37   : > { %s3437_s6 = sld [smem:[#allocation19_spill]]  ;;  %p2374_p3 = scmp.ne.s32.totalorder %s2847_s21, 0 }
  0x38   : > { %s3035_s16 = scalar_select %p701_p7, %s2847_s21, 1 }
  0x3a   : > { %s2429_s29 = sshll.u32 %s3035_s16, 4  ;;  %s725_s15 = scalar_lea.vmem %s3409_s8, %s3035_s16 }
  0x3b   : > { %s728_s19 = scalar_lea.vmem %s3410_s9, %s3035_s16  ;;  %s2432_s14 = sshll.u32 %s3035_s16, 5 }
  0x3c   : > { %s3053_s0 = scalar_lea.vmem %s3436_s4, %s2429_s29  ;;  %s3075_s4 = scalar_lea.vmem %s3411_s10, %s2429_s29 }
  0x3d   : > { %s3058_s23 = scalar_lea.vmem %s3437_s6, %s2429_s29  ;;  %s736_s6 = scalar_lea.vmem %s3412_s11, %s3035_s16 }
  0x3e   : > { %s3085_s25 = scalar_lea.vmem %s3413_s12, %s2432_s14  ;;  %s744_s30 = scalar_lea.vmem %s3414_s13, %s3035_s16 }
  0x3f   : > { %750 = sbr.rel (%p2374_p3) target bundleno = 70 (0x46), region = 96 }
  0x44   : > { %v751_v0 = vld [vmem:[#allocation7] sm:$0xff]  ;;  %vm753_vm0 = vcmask 261120   ;;  %v752_v1 = vld [vmem:[#allocation7 + $0x8] sm:$0xff] }
  0x45   : > { %754 = vst.msk [vmem:[#allocation2] sm:$0xff] %vm753_vm0, %v751_v0  ;;  %755 = vst.msk [vmem:[#allocation2 + $0x8] sm:$0xff] %vm753_vm0, %v752_v1 }
  0x46 PF: > { %vm760_vm1 = vcmask 261120   ;;  %v2690_v16 = vld [vmem:[%s3053_s0 + $0x8] sm:$0xff]   ;;  %v2863_v17 = vmov 0.0   ;;  %vm2864_vm2 = vmmov 0   ;;  %v2691_v18 = vld [vmem:[%s3053_s0] sm:$0xff]   ;;  %s3438_s0 = scalar_lea.vmem %s3403_s2, %s3035_s16  ;;  %s3439_s28 = scalar_lea.vmem %s3404_s3, %s3035_s16  ;;  %vm885_vm3 = vcmask 64512  }
  0x47   : > { %2485 = vmatprep.subr.bf16.mxu0 %v2863_v17  ;;  %2489 = vmatprep.mubr.msk.bf16.mxu0 %vm2864_vm2, %v2863_v17  ;;  %v2375_v27 = vld [vmem:[%s3438_s0] ss:$0 sm:$0xff]  ;;  %s3440_s1 = scalar_lea.vmem %s3406_s5, %s3035_s16  ;;  %s2865_s24 = smov 88   ;;  %vm949_vm4 = vcmask 1043456   ;;  %vm994_vm5 = vcmask 60416   ;;  %vm1114_vm6 = vcmask 126016  }
  0x48   : > { %2486 = vmatpush3.bf16.msra.mxu0 %v2690_v16  ;;  %2493 = vmatprep.subr.bf16.mxu1 %v2863_v17  ;;  %v2376_v31 = vld [vmem:[%s3439_s28] ss:$0 sm:$0xff]  ;;  %s2866_s27 = smov 96   ;;  %s2867_s26 = smov 112   ;;  %vm1233_vm7 = vcmask 191616   ;;  %vm1352_vm8 = vcmask 257216  }
  0x49   : > { %2487 = vmatprep.subr.bf16.mxu0 %v2863_v17  ;;  %2495 = vmatprep.mubr.msk.bf16.mxu1 %vm2864_vm2, %v2863_v17  ;;  %v2377_v36 = vld [vmem:[%s3440_s1] ss:$0 sm:$0xff]  ;;  %s2868_s14 = smov 120   ;;  %s2869_s29 = smov 104   ;;  %vm2054_vm9 = vcmask 523264  }
  0x4a   : > { %s2870_s0 = smov 80   ;;  %s2871_s17 = smov 72  }
  0x4b   : > { %s2872_s20 = smov 64   ;;  %s2873_s28 = smov 56  }
  0x4c   : > { %v3092_v2 = vld [vmem:[#allocation2] sm:$0xff]  ;;  %v3094_v3 = vld [vmem:[#allocation2 + $0x8] sm:$0xff]  ;;  %2488 = vmatpush3.bf16.msra.mxu0 %v2691_v18  ;;  %s2874_s18 = smov 48   ;;  %s2875_s22 = smov 40  }
  0x4d   : > { %v761_v4 = vsel %vm760_vm1, %v3092_v2, 0.0  ;;  %v764_v5 = vsel %vm760_vm1, %v3094_v3, 0.0  ;;  %2499 = vmatprep.subr.bf16.mxu0 %v2863_v17  ;;  %s2876_s1 = smov 8   ;;  %p2422_p4 = scmp.ne.s32.totalorder %s2847_s21, 1 }
  0x4e   : > { %762 = vadd.xlane.f32.xlu0 %v761_v4 }
  0x52   : > { %765 = vadd.xlane.f32.xlu0 %v764_v5 }
  0xd7   : > { %v763_v6 = vpop.xlane.xlu0 %762 }
  0xd8   : > { %v768_v7 = vmul.f32 0.03125, %v763_v6 }
  0xda   : > { %v770_v8 = vsub.f32 %v3092_v2, %v768_v7 }
  0xdb   : > { %v766_v9 = vpop.xlane.xlu0 %765 }
  0xdc   : > { %v769_v10 = vmul.f32 0.03125, %v766_v9  ;;  %v772_v11 = vmul.f32 %v770_v8, %v770_v8  ;;  %v2381_v9 = vld [vmem:[#allocation4] ss:$0 sm:$0xff] }
  0xde   : > { %v771_v12 = vsub.f32 %v3094_v3, %v769_v10  ;;  %v774_v13 = vsel %vm760_vm1, %v772_v11, 0.0 }
  0xdf   : > { %775 = vadd.xlane.f32.xlu1 %v774_v13 }
  0xe0   : > { %v773_v14 = vmul.f32 %v771_v12, %v771_v12 }
  0xe2   : > { %v777_v15 = vsel %vm760_vm1, %v773_v14, 0.0 }
  0xe3   : > { %778 = vadd.xlane.f32.xlu1 %v777_v15 }
 0x168   : > { %v776_v19 = vpop.xlane.xlu1 %775 }
 0x169   : > { %v780_v20 = vmul.f32 0.03125, %v776_v19 }
 0x16b   : > { %v782_v21 = vadd.f32 1e-05, %v780_v20 }
 0x16c   : > { %v779_v22 = vpop.xlane.xlu1 %778 }
 0x16d   : > { %2701 = vrsqrt.f32 %v782_v21  ;;  %v781_v23 = vmul.f32 0.03125, %v779_v22 }
 0x16f   : > { %v783_v24 = vadd.f32 1e-05, %v781_v23 }
 0x171   : > { %2703 = vrsqrt.f32 %v783_v24 }
 0x17a   : > { %v2702_v25 = vpop.eup %2701 }
 0x17b   : > { %v786_v26 = vmul.f32 %v2702_v25, %v770_v8 }
 0x17d   : > { %v794_v30 = vmul.f32 %v2375_v27, %v786_v26 }
 0x17e   : > { %v2704_v28 = vpop.eup %2703 }
 0x17f   : > { %v787_v29 = vmul.f32 %v2704_v28, %v771_v12  ;;  %v802_v33 = vadd.f32 %v2376_v31, %v794_v30 }
 0x181   : > { %v795_v32 = vmul.f32 %v2375_v27, %v787_v29 }
 0x183   : > { %v803_v34 = vadd.f32 %v2376_v31, %v795_v32 }
 0x185   : > { %v804_v35 = vpack.c.bf16 %v803_v34, %v802_v33 }
 0x187   : > { %2490 = vmatmul.mubr.msk.bf16.vlgmr.msra.gmra.mxu0 %vm760_vm1, %v804_v35 }
 0x188   : > { %2501 = vmatprep.mubr.msk.bf16.mxu0 %vm2864_vm2, %v2863_v17 }
 0x247   : > { %v865_v37 = vpop.f32.mrf.mxu0 }
 0x248   : > { %v866_v38 = vadd.f32 %v2377_v36, %v865_v37 }
 0x249   : > { %v2491_v39 = vpop.f32.mrf.mxu0 }
 0x24a   : > { %v873_v40 = vmul.f32 0.35355338, %v866_v38  ;;  %v3132_v41 = vpack.c.bf16 %v866_v38, %v866_v38 }
 0x24b   : > { %v868_v42 = vpop.f32.mrf.mxu0 }
 0x24c   : > { %999 = vrot.lane.b32.xlu1 %v3132_v41, %s2865_s24  ;;  %883 = vrot.lane.b32.xlu0 %v3132_v41, %s2866_s27  ;;  %v874_v44 = vpack.c.bf16 %v873_v40, %v873_v40  ;;  %v869_v45 = vadd.f32 %v2377_v36, %v868_v42 }
 0x24d   : > { %v2492_v43 = vpop.f32.mrf.mxu0 }
 0x24e   : > { %v3137_v46 = vpack.c.bf16 %v869_v45, %v869_v45  ;;  %v1356_v47 = vmul.f32 0.35355338, %v869_v45 }
 0x250   : > { %1116 = vrot.lane.b32.xlu0 %v874_v44, %s2867_s26  ;;  %997 = vrot.lane.b32.xlu1 %v874_v44, %s2868_s14  ;;  %v1357_v48 = vpack.c.bf16 %v1356_v47, %v1356_v47 }
 0x254   : > { %1235 = vrot.lane.b32.xlu0 %v874_v44, %s2869_s29  ;;  %1118 = vrot.lane.b32.xlu1 %v3132_v41, %s2870_s0 }
 0x258   : > { %1237 = vrot.lane.b32.xlu1 %v3132_v41, %s2871_s17  ;;  %1479 = vrot.lane.b32.xlu0 %v3137_v46, %s2865_s24  ;;  %s2877_s24 = smov 16  }
 0x25c   : > { %1597 = vrot.lane.b32.xlu0 %v3137_v46, %s2870_s0  ;;  %1366 = vrot.lane.b32.xlu1 %v3137_v46, %s2866_s27  ;;  %s2878_s27 = smov 24  }
 0x260   : > { %1715 = vrot.lane.b32.xlu0 %v3137_v46, %s2871_s17  ;;  %1477 = vrot.lane.b32.xlu1 %v1357_v48, %s2868_s14  ;;  %s3441_s14 = scalar_lea.vmem %s3408_s7, %s3035_s16  ;;  %s3442_s16 = sld [smem:[#allocation20_spill]] (!%p2422_p4) }
 0x264   : > { %1595 = vrot.lane.b32.xlu1 %v1357_v48, %s2867_s26 }
 0x268   : > { %1713 = vrot.lane.b32.xlu1 %v1357_v48, %s2869_s29 }
 0x2be   : > { %v884_v49 = vpop.permute.xlu0 %883  ;;  %v1000_v51 = vpop.permute.xlu1 %999 }
 0x2bf   : > { %v890_v50 = vsel %vm885_vm3, %v884_v49, 0  ;;  %v1005_v53 = vsel %vm885_vm3, %v1000_v51, 0  ;;  %v2393_v49 = vld [vmem:[#allocation4 + $0x1] ss:$0 sm:$0xff] }
 0x2c0   : > { %2494 = vmatpush3.bf16.xpose.msra.mxu1 %v890_v50 }
 0x2c1   : > { %2505 = vmatprep.subr.bf16.mxu1 %v2863_v17 }
 0x2c2   : > { %v998_v52 = vpop.permute.xlu1 %997  ;;  %v1117_v57 = vpop.permute.xlu0 %1116 }
 0x2c6   : > { %v1119_v54 = vpop.permute.xlu1 %1118  ;;  %v1236_v60 = vpop.permute.xlu0 %1235 }
 0x2c7   : > { %2496 = vmatmul.mubr.msk.bf16.vlgmr.msra.gmra.mxu1 %vm885_vm3, %v874_v44  ;;  %v1124_v55 = vsel %vm885_vm3, %v1119_v54, 0 }
 0x2c8   : > { %2506 = vmatpush3.bf16.xpose.msra.mxu1 %v1005_v53  ;;  %2507 = vmatprep.mubr.msk.bf16.mxu1 %vm2864_vm2, %v2863_v17 }
 0x2c9   : > { %2517 = vmatprep.subr.bf16.mxu1 %v2863_v17 }
 0x2ca   : > { %v1238_v56 = vpop.permute.xlu1 %1237  ;;  %v1480_v62 = vpop.permute.xlu0 %1479 }
 0x2cb   : > { %v1243_v58 = vsel %vm885_vm3, %v1238_v56, 0  ;;  %v1485_v63 = vsel %vm885_vm3, %v1480_v62, 0 }
 0x2ce   : > { %v1367_v59 = vpop.permute.xlu1 %1366  ;;  %v1598_v0 = vpop.permute.xlu0 %1597 }
 0x2cf   : > { %2508 = vmatmul.mubr.msk.bf16.vlgmr.msra.gmra.mxu1 %vm885_vm3, %v998_v52  ;;  %v1372_v61 = vsel %vm885_vm3, %v1367_v59, 0  ;;  %v1603_v4 = vsel %vm885_vm3, %v1598_v0, 0 }
 0x2d0   : > { %2518 = vmatpush3.bf16.xpose.msra.mxu1 %v1124_v55  ;;  %2519 = vmatprep.mubr.msk.bf16.mxu1 %vm2864_vm2, %v2863_v17 }
 0x2d1   : > { %2529 = vmatprep.subr.bf16.mxu1 %v2863_v17 }
 0x2d2   : > { %v1478_v1 = vpop.permute.xlu1 %1477  ;;  %v1716_v5 = vpop.permute.xlu0 %1715 }
 0x2d3   : > { %v1721_v7 = vsel %vm885_vm3, %v1716_v5, 0 }
 0x2d6   : > { %v1596_v6 = vpop.permute.xlu1 %1595 }
 0x2d7   : > { %2520 = vmatmul.mubr.msk.bf16.vlgmr.msra.gmra.mxu1 %vm885_vm3, %v1117_v57 }
 0x2d8   : > { %2530 = vmatpush3.bf16.xpose.msra.mxu1 %v1243_v58  ;;  %2531 = vmatprep.mubr.msk.bf16.mxu1 %vm2864_vm2, %v2863_v17 }
 0x2d9   : > { %2541 = vmatprep.subr.bf16.mxu1 %v2863_v17 }
 0x2da   : > { %v1714_v8 = vpop.permute.xlu1 %1713 }
 0x2df   : > { %2532 = vmatmul.mubr.msk.bf16.vlgmr.msra.gmra.mxu1 %vm885_vm3, %v1236_v60 }
 0x2e0   : > { %2542 = vmatpush3.bf16.xpose.msra.mxu1 %v1372_v61  ;;  %2543 = vmatprep.mubr.msk.bf16.mxu1 %vm2864_vm2, %v2863_v17 }
 0x2e1   : > { %2553 = vmatprep.subr.bf16.mxu1 %v2863_v17 }
 0x2e7   : > { %2544 = vmatmul.mubr.msk.bf16.vlgmr.msra.gmra.mxu1 %vm885_vm3, %v1357_v48 }
 0x2e8   : > { %2554 = vmatpush3.bf16.xpose.msra.mxu1 %v1485_v63  ;;  %2555 = vmatprep.mubr.msk.bf16.mxu1 %vm2864_vm2, %v2863_v17 }
 0x2e9   : > { %2565 = vmatprep.subr.bf16.mxu1 %v2863_v17 }
 0x2ef   : > { %2556 = vmatmul.mubr.msk.bf16.vlgmr.msra.gmra.mxu1 %vm885_vm3, %v1478_v1 }
 0x2f0   : > { %2566 = vmatpush3.bf16.xpose.msra.mxu1 %v1603_v4  ;;  %2567 = vmatprep.mubr.msk.bf16.mxu1 %vm2864_vm2, %v2863_v17 }
 0x2f1   : > { %2577 = vmatprep.subr.bf16.mxu1 %v2863_v17 }
 0x2f7   : > { %2568 = vmatmul.mubr.msk.bf16.vlgmr.msra.gmra.mxu1 %vm885_vm3, %v1596_v6 }
 0x2f8   : > { %2578 = vmatpush3.bf16.xpose.msra.mxu1 %v1721_v7  ;;  %2579 = vmatprep.mubr.msk.bf16.mxu1 %vm2864_vm2, %v2863_v17 }
 0x2f9   : > { %2589 = vmatprep.subr.bf16.mxu1 %v2863_v17 }
 0x2ff   : > { %2580 = vmatmul.mubr.msk.bf16.vlgmr.msra.gmra.mxu1 %vm885_vm3, %v1714_v8 }
 0x300   : > { %2593 = vmatprep.mubr.msk.bf16.mxu1 %vm2864_vm2, %v2863_v17 }
 0x387   : > { %v926_v10 = vpop.f32.mrf.mxu1 }
 0x388   : > { %v3184_v11 = vadd.f32 %v2381_v9, %v926_v10 }
 0x389   : > { %v2497_v12 = vpop.f32.mrf.mxu1 }
 0x38a   : > { %v932_v13 = vsel %vm885_vm3, %v3184_v11, -inf }
 0x38b   : > { %v929_v14 = vpop.f32.mrf.mxu1  ;;  %933 = vmax.xlane.f32.xlu0 %v932_v13 }
 0x38d   : > { %v2498_v15 = vpop.f32.mrf.mxu1 }
 0x38f   : > { %v1041_v16 = vpop.f32.mrf.mxu1 }
 0x390   : > { %v3188_v18 = vadd.f32 %v2381_v9, %v1041_v16 }
 0x391   : > { %v2509_v19 = vpop.f32.mrf.mxu1 }
 0x392   : > { %v1047_v20 = vsel %vm885_vm3, %v3188_v18, -inf }
 0x393   : > { %v1044_v21 = vpop.f32.mrf.mxu1  ;;  %1048 = vmax.xlane.f32.xlu1 %v1047_v20 }
 0x395   : > { %v2510_v22 = vpop.f32.mrf.mxu1 }
 0x397   : > { %v1160_v23 = vpop.f32.mrf.mxu1 }
 0x398   : > { %v1161_v42 = vadd.f32 %v2381_v9, %v1160_v23 }
 0x399   : > { %v2521_v24 = vpop.f32.mrf.mxu1 }
 0x39a   : > { %v1166_v48 = vsel %vm885_vm3, %v1161_v42, -inf }
 0x39b   : > { %v1163_v25 = vpop.f32.mrf.mxu1 }
 0x39d   : > { %v2522_v26 = vpop.f32.mrf.mxu1 }
 0x39f   : > { %v1279_v27 = vpop.f32.mrf.mxu1 }
 0x3a0   : > { %v1280_v45 = vadd.f32 %v2381_v9, %v1279_v27 }
 0x3a1   : > { %v2533_v28 = vpop.f32.mrf.mxu1  ;;  %944 = vrot.lane.b32.xlu0 %v3132_v41, %s2872_s20 }
 0x3a2   : > { %v1285_v54 = vsel %vm885_vm3, %v1280_v45, -inf }
 0x3a3   : > { %v1282_v29 = vpop.f32.mrf.mxu1 }
 0x3a4   : > { %1059 = vrot.lane.b32.xlu1 %v3132_v41, %s2873_s28 }
 0x3a5   : > { %v2534_v30 = vpop.f32.mrf.mxu1 }
 0x3a7   : > { %v1408_v31 = vpop.f32.mrf.mxu1 }
 0x3a8   : > { %v1409_v51 = vadd.f32 %v2393_v49, %v1408_v31 }
 0x3a9   : > { %v2545_v32 = vpop.f32.mrf.mxu1 }
 0x3aa   : > { %v1414_v58 = vsel %vm885_vm3, %v1409_v51, -inf }
 0x3ab   : > { %v1411_v33 = vpop.f32.mrf.mxu1 }
 0x3ad   : > { %v2546_v34 = vpop.f32.mrf.mxu1 }
 0x3af   : > { %v1521_v35 = vpop.f32.mrf.mxu1 }
 0x3b0   : > { %v1522_v52 = vadd.f32 %v2393_v49, %v1521_v35 }
 0x3b1   : > { %v2557_v36 = vpop.f32.mrf.mxu1 }
 0x3b2   : > { %v1527_v59 = vsel %vm885_vm3, %v1522_v52, -inf }
 0x3b3   : > { %v1524_v37 = vpop.f32.mrf.mxu1 }
 0x3b5   : > { %v2558_v38 = vpop.f32.mrf.mxu1 }
 0x3b7   : > { %v1639_v39 = vpop.f32.mrf.mxu1 }
 0x3b8   : > { %v3198_v56 = vadd.f32 %v2393_v49, %v1639_v39 }
 0x3b9   : > { %v2569_v40 = vpop.f32.mrf.mxu1 }
 0x3ba   : > { %v1645_v60 = vsel %vm885_vm3, %v3198_v56, -inf }
 0x3bb   : > { %v1642_v43 = vpop.f32.mrf.mxu1 }
 0x3bd   : > { %v2570_v44 = vpop.f32.mrf.mxu1 }
 0x3bf   : > { %v1757_v47 = vpop.f32.mrf.mxu1 }
 0x3c0   : > { %1167 = vmax.xlane.f32.xlu0 %v1166_v48  ;;  %v3200_v57 = vadd.f32 %v2393_v49, %v1757_v47 }
 0x3c1   : > { %v2581_v50 = vpop.f32.mrf.mxu1 }
 0x3c2   : > { %v1763_v61 = vsel %vm885_vm3, %v3200_v57, -inf }
 0x3c3   : > { %v1760_v53 = vpop.f32.mrf.mxu1 }
 0x3c4   : > { %1286 = vmax.xlane.f32.xlu0 %v1285_v54 }
 0x3c5   : > { %v2582_v55 = vpop.f32.mrf.mxu1 }
 0x3c8   : > { %1415 = vmax.xlane.f32.xlu0 %v1414_v58  ;;  %1528 = vmax.xlane.f32.xlu1 %v1527_v59 }
 0x3cc   : > { %1646 = vmax.xlane.f32.xlu0 %v1645_v60  ;;  %1764 = vmax.xlane.f32.xlu1 %v1763_v61 }
 0x3e2   : > { %1178 = vrot.lane.b32.xlu0 %v3132_v41, %s2874_s18 }
 0x414   : > { %v934_v62 = vpop.xlane.xlu0 %933 }
 0x415   : > { %v935_v63 = vsub.f32 %v3184_v11, %v934_v62 }
 0x417   : > { %v936_v0 = vmul.f32 1.442695, %v935_v63 }
 0x418   : > { %v945_v1 = vpop.permute.xlu0 %944 }
 0x419   : > { %2705 = vpow2.f32 %v936_v0  ;;  %v951_v4 = vsel %vm949_vm4, %v945_v1, 0 }
 0x41a   : > { %2500 = vmatpush3.bf16.msra.mxu0 %v951_v4 }
 0x41b   : > { %2511 = vmatprep.subr.bf16.mxu0 %v2863_v17 }
 0x41c   : > { %v1049_v5 = vpop.xlane.xlu1 %1048 }
 0x41d   : > { %v1050_v6 = vsub.f32 %v3188_v18, %v1049_v5 }
 0x41f   : > { %v1051_v7 = vmul.f32 1.442695, %v1050_v6 }
 0x420   : > { %v1060_v15 = vpop.permute.xlu1 %1059 }
 0x421   : > { %2707 = vpow2.f32 %v1051_v7 }
 0x426   : > { %v2706_v8 = vpop.eup %2705 }
 0x427   : > { %v938_v9 = vsel %vm885_vm3, %v2706_v8, 0.0 }
 0x428   : > { %939 = vadd.xlane.f32.xlu0 %v938_v9 }
 0x42e   : > { %v3215_v10 = vpop.eup %2707 }
 0x42f   : > { %v1053_v11 = vsel %vm885_vm3, %v3215_v10, 0.0 }
 0x430   : > { %1054 = vadd.xlane.f32.xlu1 %v1053_v11 }
 0x441   : > { %1426 = vrot.lane.b32.xlu1 %v3137_v46, %s2872_s20 }
 0x449   : > { %v1168_v12 = vpop.xlane.xlu0 %1167 }
 0x44a   : > { %v1169_v13 = vsub.f32 %v1161_v42, %v1168_v12 }
 0x44c   : > { %v1170_v14 = vmul.f32 1.442695, %v1169_v13 }
 0x44d   : > { %v1287_v16 = vpop.xlane.xlu0 %1286 }
 0x44e   : > { %2709 = vpow2.f32 %v1170_v14  ;;  %v1288_v18 = vsub.f32 %v1280_v45, %v1287_v16 }
 0x450   : > { %v1289_v19 = vmul.f32 1.442695, %v1288_v18 }
 0x451   : > { %v1416_v20 = vpop.xlane.xlu0 %1415  ;;  %v1529_v21 = vpop.xlane.xlu1 %1528 }
 0x452   : > { %v1417_v22 = vsub.f32 %v1409_v51, %v1416_v20  ;;  %2711 = vpow2.f32 %v1289_v19  ;;  %v1530_v24 = vsub.f32 %v1522_v52, %v1529_v21  ;;  %v1065_v51 = vsel %vm949_vm4, %v1060_v15, 0 }
 0x454   : > { %v1418_v23 = vmul.f32 1.442695, %v1417_v22  ;;  %v1531_v25 = vmul.f32 1.442695, %v1530_v24 }
 0x455   : > { %v1647_v34 = vpop.xlane.xlu0 %1646  ;;  %v1765_v37 = vpop.xlane.xlu1 %1764 }
 0x456   : > { %2713 = vpow2.f32 %v1418_v23  ;;  %v1648_v35 = vsub.f32 %v3198_v56, %v1647_v34  ;;  %v1766_v38 = vsub.f32 %v3200_v57, %v1765_v37 }
 0x457   : > { %2715 = vpow2.f32 %v1531_v25 }
 0x458   : > { %v1649_v36 = vmul.f32 1.442695, %v1648_v35  ;;  %v1767_v39 = vmul.f32 1.442695, %v1766_v38 }
 0x459   : > { %v1179_v44 = vpop.permute.xlu0 %1178 }
 0x45a   : > { %2717 = vpow2.f32 %v1649_v36 }
 0x45b   : > { %v2710_v26 = vpop.eup %2709  ;;  %2719 = vpow2.f32 %v1767_v39 }
 0x45c   : > { %v1172_v27 = vsel %vm885_vm3, %v2710_v26, 0.0 }
 0x45d   : > { %1173 = vadd.xlane.f32.xlu0 %v1172_v27 }
 0x45f   : > { %v3222_v28 = vpop.eup %2711 }
 0x460   : > { %v1291_v29 = vsel %vm885_vm3, %v3222_v28, 0.0 }
 0x463   : > { %v3226_v30 = vpop.eup %2713 }
 0x464   : > { %v1420_v31 = vsel %vm885_vm3, %v3226_v30, 0.0  ;;  %v3230_v32 = vpop.eup %2715 }
 0x465   : > { %1292 = vadd.xlane.f32.xlu1 %v1291_v29  ;;  %v1533_v33 = vsel %vm885_vm3, %v3230_v32, 0.0 }
 0x467   : > { %v3239_v40 = vpop.eup %2717 }
 0x468   : > { %v1651_v42 = vsel %vm885_vm3, %v3239_v40, 0.0 }
 0x469   : > { %1421 = vadd.xlane.f32.xlu1 %v1420_v31 }
 0x46d   : > { %1534 = vadd.xlane.f32.xlu1 %v1533_v33 }
 0x473   : > { %1297 = vrot.lane.b32.xlu0 %v3132_v41, %s2875_s22  ;;  %v3243_v41 = vpop.eup %2719 }
 0x474   : > { %v1769_v43 = vsel %vm885_vm3, %v3243_v41, 0.0 }
 0x47e   : > { %1539 = vrot.lane.b32.xlu1 %v3137_v46, %s2873_s28 }
 0x492   : > { %1652 = vadd.xlane.f32.xlu0 %v1651_v42 }
 0x4a2   : > { %1770 = vadd.xlane.f32.xlu1 %v1769_v43 }
 0x4a8   : > { %1657 = vrot.lane.b32.xlu0 %v3137_v46, %s2874_s18  ;;  %s3443_s18 = sld [smem:[#allocation21_spill]] (!%p2422_p4) }
 0x4b1   : > { %v940_v45 = vpop.xlane.xlu0 %939 }
 0x4b2   : > { %2721 = vrcp.f32 %v940_v45 }
 0x4b3   : > { %1775 = vrot.lane.b32.xlu1 %v3137_v46, %s2875_s22  ;;  %v1184_v46 = vsel %vm949_vm4, %v1179_v44, 0 }
 0x4b9   : > { %v1055_v47 = vpop.xlane.xlu1 %1054 }
 0x4ba   : > { %2723 = vrcp.f32 %v1055_v47 }
 0x4bd   : > { %v1427_v56 = vpop.permute.xlu1 %1426 }
 0x4be   : > { %v1432_v7 = vsel %vm949_vm4, %v1427_v56, 0 }
 0x4bf   : > { %v2722_v48 = vpop.eup %2721 }
 0x4c0   : > { %v942_v49 = vmul.f32 %v2722_v48, %v2706_v8 }
 0x4c2   : > { %v943_v50 = vpack.c.bf16 %v942_v49, %v942_v49 }
 0x4c4   : > { %2502 = vmatmul.mubr.msk.bf16.vlgmr.msra.gmra.mxu0 %vm885_vm3, %v943_v50 }
 0x4c5   : > { %2512 = vmatpush3.bf16.msra.mxu0 %v1065_v51  ;;  %2513 = vmatprep.mubr.msk.bf16.mxu0 %vm2864_vm2, %v2863_v17 }
 0x4c6   : > { %2523 = vmatprep.subr.bf16.mxu0 %v2863_v17 }
 0x4c7   : > { %v2724_v52 = vpop.eup %2723 }
 0x4c8   : > { %v1057_v53 = vmul.f32 %v2724_v52, %v3215_v10 }
 0x4ca   : > { %v1058_v54 = vpack.c.bf16 %v1057_v53, %v1057_v53 }
 0x4cc   : > { %2514 = vmatmul.mubr.msk.bf16.vlgmr.msra.gmra.mxu0 %vm885_vm3, %v1058_v54 }
 0x4cd   : > { %2524 = vmatpush3.bf16.msra.mxu0 %v1184_v46  ;;  %2525 = vmatprep.mubr.msk.bf16.mxu0 %vm2864_vm2, %v2863_v17 }
 0x4ce   : > { %2535 = vmatprep.subr.bf16.mxu0 %v2863_v17 }
 0x4e6   : > { %v1174_v55 = vpop.xlane.xlu0 %1173 }
 0x4e7   : > { %2725 = vrcp.f32 %v1174_v55 }
 0x4ea   : > { %v1298_v61 = vpop.permute.xlu0 %1297 }
 0x4eb   : > { %v1303_v0 = vsel %vm949_vm4, %v1298_v61, 0 }
 0x4ee   : > { %v1293_v57 = vpop.xlane.xlu1 %1292 }
 0x4ef   : > { %2727 = vrcp.f32 %v1293_v57 }
 0x4f2   : > { %v1422_v58 = vpop.xlane.xlu1 %1421 }
 0x4f3   : > { %2729 = vrcp.f32 %v1422_v58 }
 0x4f4   : > { %v2726_v59 = vpop.eup %2725 }
 0x4f5   : > { %v1176_v60 = vmul.f32 %v2726_v59, %v2710_v26 }
 0x4f6   : > { %v1535_v63 = vpop.xlane.xlu1 %1534 }
 0x4f7   : > { %v1177_v62 = vpack.c.bf16 %v1176_v60, %v1176_v60  ;;  %2731 = vrcp.f32 %v1535_v63  ;;  %v2692_v63 = vld [vmem:[%s3058_s23 + $0x8] sm:$0xff]  }
 0x4f8   : > { %2590 = vmatpush3.bf16.msra.mxu1 %v2692_v63 }
 0x4f9   : > { %2526 = vmatmul.mubr.msk.bf16.vlgmr.msra.gmra.mxu0 %vm885_vm3, %v1177_v62  ;;  %2591 = vmatprep.subr.bf16.mxu1 %v2863_v17 }
 0x4fa   : > { %2536 = vmatpush3.bf16.msra.mxu0 %v1303_v0  ;;  %2537 = vmatprep.mubr.msk.bf16.mxu0 %vm2864_vm2, %v2863_v17  ;;  %v1540_v9 = vpop.permute.xlu1 %1539  ;;  %v2693_v0 = vld [vmem:[%s3058_s23] sm:$0xff]  }
 0x4fb   : > { %2547 = vmatprep.subr.bf16.mxu0 %v2863_v17  ;;  %v1545_v12 = vsel %vm949_vm4, %v1540_v9, 0 }
 0x4fc   : > { %v2728_v1 = vpop.eup %2727  ;;  %2592 = vmatpush3.bf16.msra.mxu1 %v2693_v0 }
 0x4fd   : > { %v1295_v4 = vmul.f32 %v2728_v1, %v3222_v28  ;;  %2605 = vmatprep.subr.bf16.mxu1 %v2863_v17 }
 0x4ff   : > { %v1296_v5 = vpack.c.bf16 %v1295_v4, %v1295_v4 }
 0x500   : > { %v2730_v6 = vpop.eup %2729 }
 0x501   : > { %2538 = vmatmul.mubr.msk.bf16.vlgmr.msra.gmra.mxu0 %vm885_vm3, %v1296_v5  ;;  %v1424_v8 = vmul.f32 %v2730_v6, %v3226_v30 }
 0x502   : > { %2548 = vmatpush3.bf16.msra.mxu0 %v1432_v7  ;;  %2549 = vmatprep.mubr.msk.bf16.mxu0 %vm2864_vm2, %v2863_v17 }
 0x503   : > { %2559 = vmatprep.subr.bf16.mxu0 %v2863_v17  ;;  %v1425_v10 = vpack.c.bf16 %v1424_v8, %v1424_v8 }
 0x504   : > { %v2732_v11 = vpop.eup %2731 }
 0x505   : > { %v1537_v13 = vmul.f32 %v2732_v11, %v3230_v32 }
 0x507   : > { %v1538_v14 = vpack.c.bf16 %v1537_v13, %v1537_v13 }
 0x509   : > { %2550 = vmatmul.mubr.msk.bf16.vlgmr.msra.gmra.mxu0 %vm885_vm3, %v1425_v10 }
 0x50a   : > { %2560 = vmatpush3.bf16.msra.mxu0 %v1545_v12  ;;  %2561 = vmatprep.mubr.msk.bf16.mxu0 %vm2864_vm2, %v2863_v17 }
 0x50b   : > { %2571 = vmatprep.subr.bf16.mxu0 %v2863_v17 }
 0x511   : > { %2562 = vmatmul.mubr.msk.bf16.vlgmr.msra.gmra.mxu0 %vm885_vm3, %v1538_v14 }
 0x512   : > { %2573 = vmatprep.mubr.msk.bf16.mxu0 %vm2864_vm2, %v2863_v17 }
 0x51b   : > { %v1653_v15 = vpop.xlane.xlu0 %1652 }
 0x51c   : > { %2733 = vrcp.f32 %v1653_v15  ;;  %v2405_v15 = vld [vmem:[%s3441_s14] ss:$0 sm:$0xff] }
 0x51f   : > { %v1658_v16 = vpop.permute.xlu0 %1657 }
 0x520   : > { %v1663_v18 = vsel %vm949_vm4, %v1658_v16, 0 }
 0x521   : > { %2572 = vmatpush3.bf16.msra.mxu0 %v1663_v18 }
 0x522   : > { %2583 = vmatprep.subr.bf16.mxu0 %v2863_v17 }
 0x529   : > { %v2734_v19 = vpop.eup %2733 }
 0x52a   : > { %v1655_v20 = vmul.f32 %v2734_v19, %v3239_v40 }
 0x52b   : > { %v1771_v21 = vpop.xlane.xlu1 %1770 }
 0x52c   : > { %2735 = vrcp.f32 %v1771_v21  ;;  %v1656_v22 = vpack.c.bf16 %v1655_v20, %v1655_v20 }
 0x52e   : > { %2574 = vmatmul.mubr.msk.bf16.vlgmr.msra.gmra.mxu0 %vm885_vm3, %v1656_v22 }
 0x52f   : > { %v1776_v23 = vpop.permute.xlu1 %1775  ;;  %2585 = vmatprep.mubr.msk.bf16.mxu0 %vm2864_vm2, %v2863_v17 }
 0x530   : > { %v1781_v24 = vsel %vm949_vm4, %v1776_v23, 0 }
 0x531   : > { %2584 = vmatpush3.bf16.msra.mxu0 %v1781_v24 }
 0x532   : > { %2597 = vmatprep.subr.bf16.mxu0 %v2863_v17 }
 0x539   : > { %v2736_v25 = vpop.eup %2735 }
 0x53a   : > { %v1773_v26 = vmul.f32 %v2736_v25, %v3243_v41 }
 0x53c   : > { %v1774_v27 = vpack.c.bf16 %v1773_v26, %v1773_v26 }
 0x53e   : > { %2586 = vmatmul.mubr.msk.bf16.vlgmr.msra.gmra.mxu0 %vm885_vm3, %v1774_v27 }
 0x53f   : > { %2601 = vmatprep.mubr.msk.bf16.mxu0 %vm2864_vm2, %v2863_v17 }
 0x584   : > { %v987_v28 = vpop.f32.mrf.mxu0 }
 0x585   : > { %v993_v29 = vpack.c.bf16 %v987_v28, %v987_v28 }
 0x586   : > { %v2503_v30 = vpop.f32.mrf.mxu0 }
 0x587   : > { %995 = vst.msk [vmem:[#allocation3] sm:$0xf] %vm994_vm5, %v993_v29 }
 0x588   : > { %v990_v31 = vpop.f32.mrf.mxu0 }
 0x58a   : > { %v2504_v32 = vpop.f32.mrf.mxu0 }
 0x58c   : > { %v1101_v33 = vpop.f32.mrf.mxu0 }
 0x58d   : > { %v2433_v34 = vpack.c.bf16 %v1101_v33, %v1101_v33 }
 0x58e   : > { %v2515_v35 = vpop.f32.mrf.mxu0 }
 0x58f   : > { %1111 = vrot.lane.b32.xlu0 %v2433_v34, %s2876_s1  ;;  %v2695_v35 = vld [vmem:[%s3075_s4 + $0x8] sm:$0xff]  }
 0x590   : > { %v1104_v36 = vpop.f32.mrf.mxu0  ;;  %2598 = vmatpush3.bf16.msra.mxu0 %v2695_v35 }
 0x591   : > { %v2696_v36 = vld [vmem:[%s3075_s4] sm:$0xff]   ;;  %2599 = vmatprep.subr.bf16.mxu0 %v2863_v17 }
 0x592   : > { %v2516_v37 = vpop.f32.mrf.mxu0 }
 0x593   : > { %v2697_v37 = vld [vmem:[%s3085_s25 + $0x18] sm:$0xff]  }
 0x594   : > { %2600 = vmatpush3.bf16.msra.mxu0 %v2696_v36 }
 0x5b9   : > { %v1220_v38 = vpop.f32.mrf.mxu0 }
 0x5ba   : > { %v2434_v39 = vpack.c.bf16 %v1220_v38, %v1220_v38 }
 0x5bb   : > { %v2527_v40 = vpop.f32.mrf.mxu0 }
 0x5bc   : > { %1230 = vrot.lane.b32.xlu0 %v2434_v39, %s2877_s24 }
 0x5bd   : > { %v1223_v42 = vpop.f32.mrf.mxu0 }
 0x5bf   : > { %v2528_v41 = vpop.f32.mrf.mxu0 }
 0x5c1   : > { %v1339_v43 = vpop.f32.mrf.mxu0 }
 0x5c2   : > { %v2435_v44 = vpack.c.bf16 %v1339_v43, %v1339_v43 }
 0x5c3   : > { %v2539_v45 = vpop.f32.mrf.mxu0 }
 0x5c4   : > { %1349 = vrot.lane.b32.xlu0 %v2435_v44, %s2878_s27 }
 0x5c5   : > { %v1342_v47 = vpop.f32.mrf.mxu0 }
 0x5c6   : > { %v2410_v47 = vld [vmem:[%s725_s15] ss:$0 sm:$0xff] }
 0x5c7   : > { %v2540_v48 = vpop.f32.mrf.mxu0 }
 0x5c9   : > { %v1468_v49 = vpop.f32.mrf.mxu0 }
 0x5ca   : > { %v1474_v50 = vpack.c.bf16 %v1468_v49, %v1468_v49 }
 0x5cb   : > { %v2551_v51 = vpop.f32.mrf.mxu0 }
 0x5cc   : > { %1475 = vst.msk [vmem:[#allocation3 + $0x4] sm:$0xf] %vm994_vm5, %v1474_v50  ;;  %v2411_v51 = vld [vmem:[%s728_s19] ss:$0 sm:$0xff] }
 0x5cd   : > { %v1471_v52 = vpop.f32.mrf.mxu0 }
 0x5cf   : > { %v2552_v53 = vpop.f32.mrf.mxu0 }
 0x5d1   : > { %v1581_v54 = vpop.f32.mrf.mxu0 }
 0x5d2   : > { %v2436_v46 = vpack.c.bf16 %v1581_v54, %v1581_v54 }
 0x5d3   : > { %v2563_v55 = vpop.f32.mrf.mxu0 }
 0x5d4   : > { %1591 = vrot.lane.b32.xlu1 %v2436_v46, %s2876_s1  ;;  %v2698_v55 = vld [vmem:[%s3085_s25 + $0x10] sm:$0xff]  }
 0x5d5   : > { %v1584_v56 = vpop.f32.mrf.mxu0 }
 0x5d6   : > { %v2699_v56 = vld [vmem:[%s3085_s25 + $0x8] sm:$0xff]  }
 0x5d7   : > { %v2564_v57 = vpop.f32.mrf.mxu0 }
 0x5d8   : > { %v2700_v57 = vld [vmem:[%s3085_s25] sm:$0xff]  }
 0x5ee   : > { %v1699_v58 = vpop.f32.mrf.mxu0 }
 0x5ef   : > { %v2437_v59 = vpack.c.bf16 %v1699_v58, %v1699_v58  ;;  %v2412_v58 = vld [vmem:[%s736_s6] ss:$0 sm:$0xff] }
 0x5f0   : > { %v2575_v60 = vpop.f32.mrf.mxu0 }
 0x5f1   : > { %1709 = vrot.lane.b32.xlu1 %v2437_v59, %s2877_s24 }
 0x5f2   : > { %v1702_v61 = vpop.f32.mrf.mxu0 }
 0x5f4   : > { %v2576_v62 = vpop.f32.mrf.mxu0 }
 0x5fe   : > { %v1817_v1 = vpop.f32.mrf.mxu0 }
 0x5ff   : > { %v2438_v4 = vpack.c.bf16 %v1817_v1, %v1817_v1 }
 0x600   : > { %v2587_v5 = vpop.f32.mrf.mxu0 }
 0x601   : > { %v1112_v6 = vpop.permute.xlu0 %1111  ;;  %1827 = vrot.lane.b32.xlu1 %v2438_v4, %s2878_s27 }
 0x602   : > { %1115 = vst.msk [vmem:[#allocation3] sm:$0xf] %vm1114_vm6, %v1112_v6  ;;  %v1820_v7 = vpop.f32.mrf.mxu0  ;;  %v2421_v6 = vld [vmem:[%s744_s30] ss:$0 sm:$0xff] }
 0x604   : > { %v2588_v8 = vpop.f32.mrf.mxu0 }
 0x62e   : > { %v1231_v9 = vpop.permute.xlu0 %1230 }
 0x62f   : > { %1234 = vst.msk [vmem:[#allocation3] sm:$0xf] %vm1233_vm7, %v1231_v9 }
 0x636   : > { %v1350_v10 = vpop.permute.xlu0 %1349 }
 0x637   : > { %1353 = vst.msk [vmem:[#allocation3] sm:$0xf] %vm1352_vm8, %v1350_v10 }
 0x646   : > { %v1592_v11 = vpop.permute.xlu1 %1591 }
 0x647   : > { %1594 = vst.msk [vmem:[#allocation3 + $0x4] sm:$0xf] %vm1114_vm6, %v1592_v11 }
 0x663   : > { %v1710_v12 = vpop.permute.xlu1 %1709 }
 0x664   : > { %1712 = vst.msk [vmem:[#allocation3 + $0x4] sm:$0xf] %vm1233_vm7, %v1710_v12 }
 0x673   : > { %v1828_v13 = vpop.permute.xlu1 %1827 }
 0x674   : > { %1830 = vst.msk [vmem:[#allocation3 + $0x4] sm:$0xf] %vm1352_vm8, %v1828_v13 }
 0x67b   : > { %v2694_v14 = vld [vmem:[#allocation3] sm:$0xff]  }
 0x67c   : > { %2594 = vmatmul.mubr.msk.bf16.vlgmr.msra.gmra.mxu1 %vm760_vm1, %v2694_v14 }
 0x67d   : > { %2613 = vmatprep.mubr.msk.bf16.mxu1 %vm2864_vm2, %v2863_v17  ;;  %2606 = vmatpush3.bf16.msra.mxu1 %v2697_v37 }
 0x67e   : > { %2607 = vmatprep.subr.bf16.mxu1 %v2863_v17 }
 0x681   : > { %2608 = vmatpush3.bf16.msra.mxu1 %v2698_v55 }
 0x682   : > { %2609 = vmatprep.subr.bf16.mxu1 %v2863_v17 }
 0x685   : > { %2610 = vmatpush3.bf16.msra.mxu1 %v2699_v56 }
 0x686   : > { %2611 = vmatprep.subr.bf16.mxu1 %v2863_v17 }
 0x689   : > { %2612 = vmatpush3.bf16.msra.mxu1 %v2700_v57 }
 0x73c   : > { %v1898_v16 = vpop.f32.mrf.mxu1 }
 0x73d   : > { %v1899_v18 = vadd.f32 %v2405_v15, %v1898_v16 }
 0x73e   : > { %v2595_v19 = vpop.f32.mrf.mxu1 }
 0x73f   : > { %v3313_v20 = vadd.f32 %v1899_v18, %v3092_v2 }
 0x740   : > { %v1901_v21 = vpop.f32.mrf.mxu1 }
 0x741   : > { %v1902_v22 = vadd.f32 %v2405_v15, %v1901_v21  ;;  %v1909_v23 = vsel %vm760_vm1, %v3313_v20, 0.0 }
 0x742   : > { %1910 = vadd.xlane.f32.xlu0 %v1909_v23  ;;  %v2596_v24 = vpop.f32.mrf.mxu1 }
 0x743   : > { %v3318_v25 = vadd.f32 %v1902_v22, %v3094_v3 }
 0x745   : > { %v1912_v26 = vsel %vm760_vm1, %v3318_v25, 0.0 }
 0x746   : > { %1913 = vadd.xlane.f32.xlu1 %v1912_v26 }
 0x7cb   : > { %v1911_v27 = vpop.xlane.xlu0 %1910 }
 0x7cc   : > { %v1915_v28 = vmul.f32 0.03125, %v1911_v27 }
 0x7ce   : > { %v1917_v2 = vsub.f32 %v3313_v20, %v1915_v28 }
 0x7cf   : > { %v1914_v29 = vpop.xlane.xlu1 %1913 }
 0x7d0   : > { %v1916_v30 = vmul.f32 0.03125, %v1914_v29  ;;  %v1919_v31 = vmul.f32 %v1917_v2, %v1917_v2 }
 0x7d2   : > { %v1918_v32 = vsub.f32 %v3318_v25, %v1916_v30  ;;  %v1921_v33 = vsel %vm760_vm1, %v1919_v31, 0.0 }
 0x7d3   : > { %1922 = vadd.xlane.f32.xlu0 %v1921_v33 }
 0x7d4   : > { %v1920_v3 = vmul.f32 %v1918_v32, %v1918_v32 }
 0x7d6   : > { %v1924_v34 = vsel %vm760_vm1, %v1920_v3, 0.0 }
 0x7d7   : > { %1925 = vadd.xlane.f32.xlu0 %v1924_v34 }
 0x85c   : > { %v1923_v38 = vpop.xlane.xlu0 %1922 }
 0x85d   : > { %v1927_v39 = vmul.f32 0.03125, %v1923_v38 }
 0x85f   : > { %v1929_v40 = vadd.f32 1e-05, %v1927_v39 }
 0x860   : > { %v1926_v42 = vpop.xlane.xlu0 %1925 }
 0x861   : > { %2737 = vrsqrt.f32 %v1929_v40  ;;  %v1928_v41 = vmul.f32 0.03125, %v1926_v42 }
 0x863   : > { %v1930_v43 = vadd.f32 1e-05, %v1928_v41 }
 0x865   : > { %2739 = vrsqrt.f32 %v1930_v43 }
 0x86e   : > { %v2738_v44 = vpop.eup %2737 }
 0x86f   : > { %v1933_v45 = vmul.f32 %v2738_v44, %v1917_v2 }
 0x871   : > { %v1941_v50 = vmul.f32 %v2410_v47, %v1933_v45 }
 0x872   : > { %v2740_v48 = vpop.eup %2739 }
 0x873   : > { %v1934_v49 = vmul.f32 %v2740_v48, %v1918_v32  ;;  %v1949_v53 = vadd.f32 %v2411_v51, %v1941_v50 }
 0x875   : > { %v1942_v52 = vmul.f32 %v2410_v47, %v1934_v49 }
 0x877   : > { %v1950_v54 = vadd.f32 %v2411_v51, %v1942_v52 }
 0x879   : > { %v1951_v46 = vpack.c.bf16 %v1950_v54, %v1949_v53 }
 0x87b   : > { %2602 = vmatmul.mubr.msk.bf16.vlgmr.msra.gmra.mxu0 %vm760_vm1, %v1951_v46 }
 0x93b   : > { %v2012_v59 = vpop.f32.mrf.mxu0 }
 0x93c   : > { %v2013_v61 = vadd.f32 %v2412_v58, %v2012_v59 }
 0x93d   : > { %v2603_v60 = vpop.f32.mrf.mxu0 }
 0x93e   : > { %v2019_v1 = vmax.f32 %v2013_v61, 0.0 }
 0x93f   : > { %v2015_v62 = vpop.f32.mrf.mxu0 }
 0x940   : > { %v2016_v63 = vadd.f32 %v2412_v58, %v2015_v62 }
 0x941   : > { %v2604_v0 = vpop.f32.mrf.mxu0 }
 0x942   : > { %v2020_v4 = vmax.f32 %v2016_v63, 0.0 }
 0x944   : > { %v2021_v5 = vpack.c.bf16 %v2020_v4, %v2019_v1 }
 0x946   : > { %2614 = vmatmul.mubr.msk.bf16.vlgmr.msra.gmra.mxu1 %vm2054_vm9, %v2021_v5 }
 0xa06   : > { %v2092_v17 = vpop.f32.mrf.mxu1 }
 0xa07   : > { %v2099_v7 = vadd.f32 %v2092_v17, %v3313_v20 }
 0xa08   : > { %v2615_v8 = vpop.f32.mrf.mxu1 }
 0xa09   : > { %v2108_v9 = vadd.f32 %v2421_v6, %v2099_v7 }
 0xa0a   : > { %v2095_v10 = vpop.f32.mrf.mxu1 }
 0xa0b   : > { %2110 = vst.msk [vmem:[#allocation2] sm:$0xff] %vm760_vm1, %v2108_v9  ;;  %v2100_v11 = vadd.f32 %v2095_v10, %v3318_v25  ;;  %2115 = sbr.rel (%p2422_p4) target bundleno = 2889 (0xb49), region = 100 }
 0xa0c   : > { %v2616_v12 = vpop.f32.mrf.mxu1 }
 0xa0d   : > { %v2109_v13 = vadd.f32 %v2421_v6, %v2100_v11 }
 0xa0f   : > { %2111 = vst.msk [vmem:[#allocation2 + $0x8] sm:$0xff] %vm760_vm1, %v2109_v13 }
 0xa10   : > { %v2118_v14 = vsel %vm760_vm1, %v2108_v9, 0.0  ;;  %v2121_v15 = vsel %vm760_vm1, %v2109_v13, 0.0  ;;  %v2423_v33 = vld [vmem:[%s3442_s16] ss:$0 sm:$0xff] }
 0xa11   : > { %2119 = vadd.xlane.f32.xlu0 %v2118_v14  ;;  %v2424_v34 = vld [vmem:[%s3443_s18] ss:$0 sm:$0xff] }
 0xa15   : > { %2122 = vadd.xlane.f32.xlu0 %v2121_v15 }
 0xa9a   : > { %v2120_v16 = vpop.xlane.xlu0 %2119 }
 0xa9b   : > { %v2124_v18 = vmul.f32 0.03125, %v2120_v16 }
 0xa9d   : > { %v2126_v19 = vsub.f32 %v2108_v9, %v2124_v18 }
 0xa9e   : > { %v2123_v20 = vpop.xlane.xlu0 %2122 }
 0xa9f   : > { %v2125_v21 = vmul.f32 0.03125, %v2123_v20  ;;  %v2128_v22 = vmul.f32 %v2126_v19, %v2126_v19 }
 0xaa1   : > { %v2127_v23 = vsub.f32 %v2109_v13, %v2125_v21  ;;  %v2130_v24 = vsel %vm760_vm1, %v2128_v22, 0.0 }
 0xaa2   : > { %2131 = vadd.xlane.f32.xlu1 %v2130_v24 }
 0xaa3   : > { %v2129_v25 = vmul.f32 %v2127_v23, %v2127_v23 }
 0xaa5   : > { %v2133_v26 = vsel %vm760_vm1, %v2129_v25, 0.0 }
 0xaa6   : > { %2134 = vadd.xlane.f32.xlu1 %v2133_v26 }
 0xb2b   : > { %v2132_v27 = vpop.xlane.xlu1 %2131 }
 0xb2c   : > { %v2136_v28 = vmul.f32 0.03125, %v2132_v27 }
 0xb2e   : > { %v2138_v2 = vadd.f32 1e-05, %v2136_v28 }
 0xb2f   : > { %v2135_v29 = vpop.xlane.xlu1 %2134 }
 0xb30   : > { %2741 = vrsqrt.f32 %v2138_v2  ;;  %v2137_v30 = vmul.f32 0.03125, %v2135_v29 }
 0xb32   : > { %v2139_v31 = vadd.f32 1e-05, %v2137_v30 }
 0xb34   : > { %2743 = vrsqrt.f32 %v2139_v31 }
 0xb3d   : > { %v2742_v32 = vpop.eup %2741 }
 0xb3e   : > { %v2142_v3 = vmul.f32 %v2742_v32, %v2126_v19 }
 0xb40   : > { %v2150_v35 = vmul.f32 %v2423_v33, %v2142_v3 }
 0xb41   : > { %v2744_v36 = vpop.eup %2743 }
 0xb42   : > { %v2158_v37 = vadd.f32 %v2424_v34, %v2150_v35  ;;  %v2143_v38 = vmul.f32 %v2744_v36, %v2127_v23 }
 0xb44   : > { %2160 = vst.msk [vmem:[#allocation9] sm:$0xff] %vm760_vm1, %v2158_v37  ;;  %v2151_v39 = vmul.f32 %v2423_v33, %v2143_v38 }
 0xb46   : > { %v2159_v40 = vadd.f32 %v2424_v34, %v2151_v39 }
 0xb48   : > { %2161 = vst.msk [vmem:[#allocation9 + $0x8] sm:$0xff] %vm760_vm1, %v2159_v40 }
 0xb49 PF: > { %s3444_s22 = sld [smem:[#allocation14_spill]]  ;;  %s2879_s23 = smov [#allocation9]  }
 0xb4a   : > { %s2171_s26 = sshll.u32 %s2879_s23, 4  ;;  %s2172_s26 = int_to_ptr.vmem [resolvable:$true] %s2171_s26 }
 0xb4b   : > { %s2797_s14 = scalar_lea.vmem %s2172_s26, 256  ;;  %p2804_p1 = scmp.lt.s32.totalorder %s2172_s26, %s2172_s26 }
 0xb4c   : > { %p2798_p12 = scmp.ne.s32.totalorder %s2172_s26, %s2797_s14  ;;  %p2805_p2 = scmp.lt.s32.totalorder %s2797_s14, %s2797_s14 }
 0xb4e   : > { %p2806_p5 = por %p2805_p2, %p2804_p1 }
 0xb4f   : > { %s3445_s24 = sadd.s32 4294967295, %s3444_s22  }
 0xb50   : > { %p3376_p6 = scmp.eq.s32.totalorder %s3445_s24, 1 }
 0xb52   : > { %p2799_p13 = pnand %p2798_p12, %p3376_p6 }
 0xb54   : > { %p2800_p0 = pneg %p2799_p13 }
 0xb56   : > { %p2807_p8 = pnand %p2806_p5, %p2800_p0 }
 0xb58   : > { %2810 = shalt.err (!%p2807_p8)
}
 0xb59   : > { %s2880_s4 = smov 128   ;;  %s3447_s17 = sld [smem:[#allocation22_spill]] }
 0xb5f   : > { %2626 = dma.vmem_to_hbm [thread:$0]  (%p3376_p6), %s2172_s26, 256, %s3447_s17, [#allocation6], %s2880_s4, %s2880_s4, %s2876_s1  }
 0xb60   : > { %2842 = dma.done.wait (%p3376_p6), [#allocation6], 256  }
 0xb61   : > { %2844 = vsyncadd (%p3376_p6), [#allocation6], 4294967040 }
 0xb62 PF: > { %s3448_s15 = sld [smem:[#allocation14_spill]] }
 0xb63   : > { %s3449_s21 = sld [smem:[#allocation13_spill]] }
 0xb64   : > { %s3450_s22 = sld [smem:[#allocation15_spill]] }
 0xb68   : > { %s29_s23 = sadd.s32 1, %s3448_s15  }
 0xb69   : > { %p26_p9 = scmp.ge.s32.totalorder %s29_s23, 4  }
 0xb6b   :  { %28 = sbr.rel (!%p26_p9) target bundleno = 12 (0xc), region = 165 }
 0xb70   :  { %2187 = vsyncpa [#allocation5], 1 }
 0xb71   :  { %2189 = vsyncpa [#allocation5 + $0x1], 1 }
 0xb72   :  { %2190 = vsyncpa [#allocation8], 1 }
 0xb73   :  { %2191 = vsyncpa [#allocation6], 1 }
 0xb74   :  { %2193 = vsyncpa [#allocation6 + $0x1], 1 }

</bundles_post_ra>
